<compile_context>
chip_gen: v5e
topology: v5e:2x2
jax: 0.10.0
libtpu: 0.0.40
codegen_flags: <defaults>
</compile_context>

<pallas_src>
import functools

import jax
import jax.numpy as jnp
from jax import lax
from jax.experimental import pallas as pl
from jax.experimental.pallas import tpu as pltpu


def _activation(x, kind):
    if kind == "relu":
        return jnp.maximum(x, 0.0)
    if kind == "elu":
        # alpha = 1; clamp the exp argument so the untaken branch stays finite.
        return jnp.where(x > 0, x, jnp.exp(jnp.minimum(x, 0.0)) - 1.0)
    if kind == "leaky_relu":
        return jnp.where(x > 0, x, 0.1 * x)
    raise ValueError(f"unknown activation: {kind}")


def _nice_block_kernel(*refs, activation, has_h):
    if has_h:
        (x_ref, h_ref, sdn_ref, sup_ref, m1_ref, m2_ref, m3_ref, b3_ref,
         o_ref) = refs
    else:
        (x_ref, sdn_ref, sup_ref, m1_ref, m2_ref, m3_ref, b3_ref,
         o_ref) = refs
        h_ref = None

    B, H, WCin = x_ref.shape
    WCout = o_ref.shape[-1]
    M = B * H  # matmul M dim: one row per (image, image-row)

    # Folded, lane-dense activation: rows = (b, y), lanes = W*Cin.
    x = x_ref[...].reshape(M, WCin).astype(jnp.float32)
    sdn = sdn_ref[...]  # (M, M): row y <- row y-1 (zero at each image top)
    sup = sup_ref[...]  # (M, M): row y <- row y+1 (zero at each image bottom)

    # ---- conv1: 3x3, pad=1, no bias — 3 wide-K banded matmuls ----
    x_dn = jnp.dot(sdn, x, preferred_element_type=jnp.float32)   # x[b, y-1]
    x_up = jnp.dot(sup, x, preferred_element_type=jnp.float32)   # x[b, y+1]
    a1 = (jnp.dot(x_dn, m1_ref[0], preferred_element_type=jnp.float32)
          + jnp.dot(x,    m1_ref[1], preferred_element_type=jnp.float32)
          + jnp.dot(x_up, m1_ref[2], preferred_element_type=jnp.float32))
    a1 = _activation(a1, activation)

    # ---- conv2: 1x1, no bias — block-diagonal matmul in the folded layout ----
    a2 = jnp.dot(a1, m2_ref[...], preferred_element_type=jnp.float32)
    if h_ref is not None:
        a2 = a2 + h_ref[...].reshape(M, -1).astype(jnp.float32)
    a2 = _activation(a2, activation)

    # ---- conv3: weight-normalized 3x3 + bias — 3 banded matmuls, shift after
    #      (output is narrower than the input, so shifting Z is cheaper) ----
    z0 = jnp.dot(a2, m3_ref[0], preferred_element_type=jnp.float32)
    z1 = jnp.dot(a2, m3_ref[1], preferred_element_type=jnp.float32)
    z2 = jnp.dot(a2, m3_ref[2], preferred_element_type=jnp.float32)
    out = (z1
           + jnp.dot(sdn, z0, preferred_element_type=jnp.float32)
           + jnp.dot(sup, z2, preferred_element_type=jnp.float32))
    out = out + b3_ref[...]  # (1, W*Cout) broadcast; bias added exactly once

    # Lane-dense store: last dim is W*Cout (128 for the demo shapes).
    o_ref[...] = out.reshape(B, H, WCout).astype(o_ref.dtype)


def _row_banded_conv_weights(w_oihw, width):
    """OIHW 3x3 weight -> 3 matrices M[ky] of shape (W*Cin, W*Cout) such that
    folded_out_row[y] = sum_ky folded_in_row[y + ky - 1] @ M[ky]."""
    cout, cin, kh, kw = w_oihw.shape
    assert kh == 3 and kw == 3
    w_t = jnp.transpose(w_oihw, (2, 3, 1, 0))            # (ky, kx, Cin, Cout)
    xi = jnp.arange(width)[:, None]
    xo = jnp.arange(width)[None, :]
    dx = xi - xo                                         # input col - output col
    valid = (jnp.abs(dx) <= 1)
    kx = jnp.clip(dx + 1, 0, 2)
    band = w_t[:, kx] * valid[None, :, :, None, None]    # (3, W, W, Cin, Cout)
    band = jnp.transpose(band, (0, 1, 3, 2, 4))          # (3, W, Cin, W, Cout)
    return band.reshape(3, width * cin, width * cout)


def _block_diag_1x1(w_oihw, width):
    """OIHW 1x1 weight -> block-diagonal (W*Cin, W*Cout) matrix."""
    w_t = jnp.transpose(w_oihw[:, :, 0, 0], (1, 0))      # (Cin, Cout)
    cin, cout = w_t.shape
    eye = jnp.eye(width, dtype=w_t.dtype)
    m = eye[:, None, :, None] * w_t[None, :, None, :]    # (W, Cin, W, Cout)
    return m.reshape(width * cin, width * cout)


def _row_shift_matrices(batch_block, height):
    """(M, M) matrices that shift folded rows by +/-1 within each image."""
    m = batch_block * height
    idx = jnp.arange(m)
    same_img = (idx[:, None] // height) == (idx[None, :] // height)
    s_dn = ((idx[None, :] == idx[:, None] - 1) & same_img).astype(jnp.float32)
    s_up = ((idx[None, :] == idx[:, None] + 1) & same_img).astype(jnp.float32)
    return s_dn, s_up


def _pick_batch_block(n, max_block=8):
    """Largest divisor of n (<= max_block) that still leaves >=2 grid steps."""
    divisors = [d for d in range(1, n + 1) if n % d == 0 and d <= max_block]
    two_steps = [d for d in divisors if n // d >= 2]
    pool = two_steps if two_steps else divisors
    return max(pool) if pool else 1


def nice_conv_block(x, w1, w2, w3_v, w3_g, b3, h=None, activation="elu",
                    batch_block=None):
    """NICEConvBlock.forward (normalize=None) as one fused Pallas TPU kernel.

    x:    (N, Cin, H, W)      NCHW, like PyTorch
    w1:   (Chid, Cin, 3, 3)   conv1 weight (OIHW), no bias
    w2:   (Chid, Chid, 1, 1)  conv2 weight (OIHW), no bias
    w3_v: (Cout, Chid, 3, 3)  conv3 weight-norm direction v
    w3_g: (Cout,)             conv3 weight-norm gain g
    b3:   (Cout,)             conv3 bias
    h:    optional (N, Chid, H, W) conditional input
    returns (N, Cout, H, W)
    """
    N, Cin, H, W = x.shape
    Chid = w1.shape[0]
    Cout = w3_v.shape[0]
    dtype = x.dtype

    if batch_block is None:
        batch_block = _pick_batch_block(N)
    if N % batch_block != 0:
        batch_block = 1
    if H % 8 != 0:
        # Keep the folded reshape layout-free (image rows aligned to sublanes).
        batch_block = 1

    # One-time boundary layout transforms (no padded HBM copy of x anymore):
    # NCHW -> folded lane-dense (N, H, W*C).
    x_f = jnp.transpose(x, (0, 2, 3, 1)).reshape(N, H, W * Cin)

    # Row-banded / block-diagonal weights so each conv is a few wide-K matmuls.
    m1 = _row_banded_conv_weights(w1.astype(jnp.float32), W)   # (3, W*Cin, W*Chid)
    m2 = _block_diag_1x1(w2.astype(jnp.float32), W)            # (W*Chid, W*Chid)

    # conv3 effective weight via weight normalization over dims (1, 2, 3).
    v32 = w3_v.astype(jnp.float32)
    v_norm = jnp.sqrt(jnp.sum(v32 * v32, axis=(1, 2, 3), keepdims=True))
    w3_eff = w3_g.reshape(-1, 1, 1, 1).astype(jnp.float32) * v32 / v_norm
    m3 = _row_banded_conv_weights(w3_eff, W)                   # (3, W*Chid, W*Cout)

    b3_f = jnp.tile(b3.astype(jnp.float32), W).reshape(1, W * Cout)
    s_dn, s_up = _row_shift_matrices(batch_block, H)
    mrows = batch_block * H

    has_h = h is not None
    inputs = [x_f]
    in_specs = [pl.BlockSpec((batch_block, H, W * Cin), lambda g: (g, 0, 0))]
    if has_h:
        h_f = jnp.transpose(h, (0, 2, 3, 1)).reshape(N, H, W * Chid)
        inputs.append(h_f)
        in_specs.append(
            pl.BlockSpec((batch_block, H, W * Chid), lambda g: (g, 0, 0)))
    inputs += [s_dn, s_up, m1, m2, m3, b3_f]
    in_specs += [
        pl.BlockSpec((mrows, mrows), lambda g: (0, 0)),
        pl.BlockSpec((mrows, mrows), lambda g: (0, 0)),
        pl.BlockSpec((3, W * Cin, W * Chid), lambda g: (0, 0, 0)),
        pl.BlockSpec((W * Chid, W * Chid), lambda g: (0, 0)),
        pl.BlockSpec((3, W * Chid, W * Cout), lambda g: (0, 0, 0)),
        pl.BlockSpec((1, W * Cout), lambda g: (0, 0)),
    ]

    kernel = functools.partial(
        _nice_block_kernel, activation=activation, has_h=has_h)

    out_f = pl.pallas_call(
        kernel,
        out_shape=jax.ShapeDtypeStruct((N, H, W * Cout), dtype),
        grid_spec=pltpu.PrefetchScalarGridSpec(
            num_scalar_prefetch=0,
            grid=(N // batch_block,),
            in_specs=in_specs,
            out_specs=pl.BlockSpec((batch_block, H, W * Cout),
                                   lambda g: (g, 0, 0)),
        ),
        compiler_params=pltpu.CompilerParams(
            dimension_semantics=("parallel",)),
    )(*inputs)

    # Un-fold lane-dense output back to NCHW.
    return jnp.transpose(out_f.reshape(N, H, W, Cout), (0, 3, 1, 2))


# ----------------------------- reference ------------------------------------
def _ref_forward(x, w1, w2, w3_v, w3_g, b3, h=None, activation="elu"):
    dn = ("NCHW", "OIHW", "NCHW")
    conv = functools.partial(
        lax.conv_general_dilated, window_strides=(1, 1), padding="SAME",
        dimension_numbers=dn, precision=lax.Precision.HIGHEST)
    out = conv(x, w1)
    out = _activation(out, activation)
    out = conv(out, w2)
    if h is not None:
        out = out + h
    out = _activation(out, activation)
    v_norm = jnp.sqrt(jnp.sum(w3_v * w3_v, axis=(1, 2, 3), keepdims=True))
    w3 = w3_g.reshape(-1, 1, 1, 1) * w3_v / v_norm
    out = conv(out, w3)
    return out + b3.reshape(1, -1, 1, 1)


if __name__ == "__main__":
    key = jax.random.PRNGKey(0)
    ks = jax.random.split(key, 7)

    N, Cin, H, W = 2, 4, 16, 16
    Chid, Cout = 32, 8
    activation = "elu"

    x = jax.random.normal(ks[0], (N, Cin, H, W), jnp.float32)
    h = jax.random.normal(ks[1], (N, Chid, H, W), jnp.float32) * 0.5
    w1 = jax.random.normal(ks[2], (Chid, Cin, 3, 3), jnp.float32) / (Cin * 9) ** 0.5
    w2 = jax.random.normal(ks[3], (Chid, Chid, 1, 1), jnp.float32) / Chid ** 0.5
    w3_v = jax.random.normal(ks[4], (Cout, Chid, 3, 3), jnp.float32) * 0.05
    w3_g = jax.random.uniform(ks[5], (Cout,), jnp.float32, 0.5, 1.5)
    b3 = jax.random.normal(ks[6], (Cout,), jnp.float32) * 0.1

    out = nice_conv_block(x, w1, w2, w3_v, w3_g, b3, h=h, activation=activation)
    out = jax.block_until_ready(out)

    ref = _ref_forward(x, w1, w2, w3_v, w3_g, b3, h=h, activation=activation)
    assert out.shape == (N, Cout, H, W), out.shape
    max_err = float(jnp.max(jnp.abs(out - ref)))
    assert jnp.allclose(out, ref, atol=1e-3, rtol=1e-3), f"mismatch, max_err={max_err}"

    print("KERNEL_OK")
</pallas_src>

<mosaic_0001>
module attributes {stable_mosaic.version = 11 : i64} {
  func.func @_nice_block_kernel(%arg0: i32, %arg1: memref<1x16x64xf32, #tpu.memory_space<vmem>>, %arg2: memref<1x16x512xf32, #tpu.memory_space<vmem>>, %arg3: memref<16x16xf32, #tpu.memory_space<vmem>>, %arg4: memref<16x16xf32, #tpu.memory_space<vmem>>, %arg5: memref<3x64x512xf32, #tpu.memory_space<vmem>>, %arg6: memref<512x512xf32, #tpu.memory_space<vmem>>, %arg7: memref<3x512x128xf32, #tpu.memory_space<vmem>>, %arg8: memref<1x128xf32, #tpu.memory_space<vmem>>, %arg9: memref<1x16x128xf32, #tpu.memory_space<vmem>>) attributes {dimension_semantics = [#tpu.dimension_semantics<parallel>], iteration_bounds = array<i64: 2>, scalar_prefetch = 0 : i64, scratch_operands = 0 : i64, tpu.core_type = #tpu.core_type<tc>, window_params = [{transform_indices = @transform_0, window_bounds = array<i64: 1, 16, 64>}, {transform_indices = @transform_1, window_bounds = array<i64: 1, 16, 512>}, {pipeline_mode = #tpu.pipeline_mode<synchronous>, transform_indices = @transform_2, window_bounds = array<i64: 16, 16>}, {pipeline_mode = #tpu.pipeline_mode<synchronous>, transform_indices = @transform_3, window_bounds = array<i64: 16, 16>}, {pipeline_mode = #tpu.pipeline_mode<synchronous>, transform_indices = @transform_4, window_bounds = array<i64: 3, 64, 512>}, {pipeline_mode = #tpu.pipeline_mode<synchronous>, transform_indices = @transform_5, window_bounds = array<i64: 512, 512>}, {pipeline_mode = #tpu.pipeline_mode<synchronous>, transform_indices = @transform_6, window_bounds = array<i64: 3, 512, 128>}, {pipeline_mode = #tpu.pipeline_mode<synchronous>, transform_indices = @transform_7, window_bounds = array<i64: 1, 128>}, {transform_indices = @transform_8, window_bounds = array<i64: 1, 16, 128>}]} {
    %c0 = arith.constant 0 : index
    %c0_0 = arith.constant 0 : index
    %c0_1 = arith.constant 0 : index
    %0 = vector.load %arg1[%c0, %c0_0, %c0_1] : memref<1x16x64xf32, #tpu.memory_space<vmem>>, vector<1x16x64xf32>
    %1 = vector.shape_cast %0 : vector<1x16x64xf32> to vector<16x64xf32>
    %c0_2 = arith.constant 0 : index
    %c0_3 = arith.constant 0 : index
    %2 = vector.load %arg3[%c0_2, %c0_3] : memref<16x16xf32, #tpu.memory_space<vmem>>, vector<16x16xf32>
    %c0_4 = arith.constant 0 : index
    %c0_5 = arith.constant 0 : index
    %3 = vector.load %arg4[%c0_4, %c0_5] : memref<16x16xf32, #tpu.memory_space<vmem>>, vector<16x16xf32>
    %cst = arith.constant dense<0.000000e+00> : vector<16x64xf32>
    %4 = tpu.matmul %2, %1, %cst {dimension_numbers = #tpu.dot_dimension_numbers<[1], [0], [0], [1], [0, 0, 1, 1], [], []>} : vector<16x16xf32>, vector<16x64xf32>, vector<16x64xf32> -> vector<16x64xf32>
    %cst_6 = arith.constant dense<0.000000e+00> : vector<16x64xf32>
    %5 = tpu.matmul %3, %1, %cst_6 {dimension_numbers = #tpu.dot_dimension_numbers<[1], [0], [0], [1], [0, 0, 1, 1], [], []>} : vector<16x16xf32>, vector<16x64xf32>, vector<16x64xf32> -> vector<16x64xf32>
    %c0_7 = arith.constant 0 : index
    %c0_8 = arith.constant 0 : index
    %c0_9 = arith.constant 0 : index
    %6 = vector.load %arg5[%c0_7, %c0_8, %c0_9] : memref<3x64x512xf32, #tpu.memory_space<vmem>>, vector<1x64x512xf32>
    %7 = vector.shape_cast %6 : vector<1x64x512xf32> to vector<64x512xf32>
    %cst_10 = arith.constant dense<0.000000e+00> : vector<16x512xf32>
    %8 = tpu.matmul %4, %7, %cst_10 {dimension_numbers = #tpu.dot_dimension_numbers<[1], [0], [0], [1], [0, 0, 1, 1], [], []>} : vector<16x64xf32>, vector<64x512xf32>, vector<16x512xf32> -> vector<16x512xf32>
    %c1 = arith.constant 1 : index
    %c0_11 = arith.constant 0 : index
    %c0_12 = arith.constant 0 : index
    %9 = vector.load %arg5[%c1, %c0_11, %c0_12] : memref<3x64x512xf32, #tpu.memory_space<vmem>>, vector<1x64x512xf32>
    %10 = vector.shape_cast %9 : vector<1x64x512xf32> to vector<64x512xf32>
    %cst_13 = arith.constant dense<0.000000e+00> : vector<16x512xf32>
    %11 = tpu.matmul %1, %10, %cst_13 {dimension_numbers = #tpu.dot_dimension_numbers<[1], [0], [0], [1], [0, 0, 1, 1], [], []>} : vector<16x64xf32>, vector<64x512xf32>, vector<16x512xf32> -> vector<16x512xf32>
    %12 = arith.addf %8, %11 : vector<16x512xf32>
    %c2 = arith.constant 2 : index
    %c0_14 = arith.constant 0 : index
    %c0_15 = arith.constant 0 : index
    %13 = vector.load %arg5[%c2, %c0_14, %c0_15] : memref<3x64x512xf32, #tpu.memory_space<vmem>>, vector<1x64x512xf32>
    %14 = vector.shape_cast %13 : vector<1x64x512xf32> to vector<64x512xf32>
    %cst_16 = arith.constant dense<0.000000e+00> : vector<16x512xf32>
    %15 = tpu.matmul %5, %14, %cst_16 {dimension_numbers = #tpu.dot_dimension_numbers<[1], [0], [0], [1], [0, 0, 1, 1], [], []>} : vector<16x64xf32>, vector<64x512xf32>, vector<16x512xf32> -> vector<16x512xf32>
    %16 = arith.addf %12, %15 : vector<16x512xf32>
    %cst_17 = arith.constant 0.000000e+00 : f32
    %17 = vector.broadcast %cst_17 : f32 to vector<16x512xf32>
    %18 = arith.cmpf ogt, %16, %17 : vector<16x512xf32>
    %cst_18 = arith.constant 0.000000e+00 : f32
    %19 = vector.broadcast %cst_18 : f32 to vector<16x512xf32>
    %20 = arith.minimumf %16, %19 : vector<16x512xf32>
    %21 = math.exp %20 : vector<16x512xf32>
    %cst_19 = arith.constant 1.000000e+00 : f32
    %22 = vector.broadcast %cst_19 : f32 to vector<16x512xf32>
    %23 = arith.subf %21, %22 : vector<16x512xf32>
    %24 = arith.select %18, %16, %23 : vector<16x512xi1>, vector<16x512xf32>
    %c0_20 = arith.constant 0 : index
    %c0_21 = arith.constant 0 : index
    %25 = vector.load %arg6[%c0_20, %c0_21] : memref<512x512xf32, #tpu.memory_space<vmem>>, vector<512x512xf32>
    %cst_22 = arith.constant dense<0.000000e+00> : vector<16x512xf32>
    %26 = tpu.matmul %24, %25, %cst_22 {dimension_numbers = #tpu.dot_dimension_numbers<[1], [0], [0], [1], [0, 0, 1, 1], [], []>} : vector<16x512xf32>, vector<512x512xf32>, vector<16x512xf32> -> vector<16x512xf32>
    %c0_23 = arith.constant 0 : index
    %c0_24 = arith.constant 0 : index
    %c0_25 = arith.constant 0 : index
    %27 = vector.load %arg2[%c0_23, %c0_24, %c0_25] : memref<1x16x512xf32, #tpu.memory_space<vmem>>, vector<1x16x512xf32>
    %28 = vector.shape_cast %27 : vector<1x16x512xf32> to vector<16x512xf32>
    %29 = arith.addf %26, %28 : vector<16x512xf32>
    %cst_26 = arith.constant 0.000000e+00 : f32
    %30 = vector.broadcast %cst_26 : f32 to vector<16x512xf32>
    %31 = arith.cmpf ogt, %29, %30 : vector<16x512xf32>
    %cst_27 = arith.constant 0.000000e+00 : f32
    %32 = vector.broadcast %cst_27 : f32 to vector<16x512xf32>
    %33 = arith.minimumf %29, %32 : vector<16x512xf32>
    %34 = math.exp %33 : vector<16x512xf32>
    %cst_28 = arith.constant 1.000000e+00 : f32
    %35 = vector.broadcast %cst_28 : f32 to vector<16x512xf32>
    %36 = arith.subf %34, %35 : vector<16x512xf32>
    %37 = arith.select %31, %29, %36 : vector<16x512xi1>, vector<16x512xf32>
    %c0_29 = arith.constant 0 : index
    %c0_30 = arith.constant 0 : index
    %c0_31 = arith.constant 0 : index
    %38 = vector.load %arg7[%c0_29, %c0_30, %c0_31] : memref<3x512x128xf32, #tpu.memory_space<vmem>>, vector<1x512x128xf32>
    %39 = vector.shape_cast %38 : vector<1x512x128xf32> to vector<512x128xf32>
    %cst_32 = arith.constant dense<0.000000e+00> : vector<16x128xf32>
    %40 = tpu.matmul %37, %39, %cst_32 {dimension_numbers = #tpu.dot_dimension_numbers<[1], [0], [0], [1], [0, 0, 1, 1], [], []>} : vector<16x512xf32>, vector<512x128xf32>, vector<16x128xf32> -> vector<16x128xf32>
    %c1_33 = arith.constant 1 : index
    %c0_34 = arith.constant 0 : index
    %c0_35 = arith.constant 0 : index
    %41 = vector.load %arg7[%c1_33, %c0_34, %c0_35] : memref<3x512x128xf32, #tpu.memory_space<vmem>>, vector<1x512x128xf32>
    %42 = vector.shape_cast %41 : vector<1x512x128xf32> to vector<512x128xf32>
    %cst_36 = arith.constant dense<0.000000e+00> : vector<16x128xf32>
    %43 = tpu.matmul %37, %42, %cst_36 {dimension_numbers = #tpu.dot_dimension_numbers<[1], [0], [0], [1], [0, 0, 1, 1], [], []>} : vector<16x512xf32>, vector<512x128xf32>, vector<16x128xf32> -> vector<16x128xf32>
    %c2_37 = arith.constant 2 : index
    %c0_38 = arith.constant 0 : index
    %c0_39 = arith.constant 0 : index
    %44 = vector.load %arg7[%c2_37, %c0_38, %c0_39] : memref<3x512x128xf32, #tpu.memory_space<vmem>>, vector<1x512x128xf32>
    %45 = vector.shape_cast %44 : vector<1x512x128xf32> to vector<512x128xf32>
    %cst_40 = arith.constant dense<0.000000e+00> : vector<16x128xf32>
    %46 = tpu.matmul %37, %45, %cst_40 {dimension_numbers = #tpu.dot_dimension_numbers<[1], [0], [0], [1], [0, 0, 1, 1], [], []>} : vector<16x512xf32>, vector<512x128xf32>, vector<16x128xf32> -> vector<16x128xf32>
    %cst_41 = arith.constant dense<0.000000e+00> : vector<16x128xf32>
    %47 = tpu.matmul %2, %40, %cst_41 {dimension_numbers = #tpu.dot_dimension_numbers<[1], [0], [0], [1], [0, 0, 1, 1], [], []>} : vector<16x16xf32>, vector<16x128xf32>, vector<16x128xf32> -> vector<16x128xf32>
    %48 = arith.addf %43, %47 : vector<16x128xf32>
    %cst_42 = arith.constant dense<0.000000e+00> : vector<16x128xf32>
    %49 = tpu.matmul %3, %46, %cst_42 {dimension_numbers = #tpu.dot_dimension_numbers<[1], [0], [0], [1], [0, 0, 1, 1], [], []>} : vector<16x16xf32>, vector<16x128xf32>, vector<16x128xf32> -> vector<16x128xf32>
    %50 = arith.addf %48, %49 : vector<16x128xf32>
    %c0_43 = arith.constant 0 : index
    %c0_44 = arith.constant 0 : index
    %51 = vector.load %arg8[%c0_43, %c0_44] : memref<1x128xf32, #tpu.memory_space<vmem>>, vector<1x128xf32>
    %52 = vector.broadcast %51 : vector<1x128xf32> to vector<16x128xf32>
    %53 = arith.addf %50, %52 : vector<16x128xf32>
    %54 = vector.shape_cast %53 : vector<16x128xf32> to vector<1x16x128xf32>
    %c0_45 = arith.constant 0 : index
    %c0_46 = arith.constant 0 : index
    %c0_47 = arith.constant 0 : index
    %55 = vector.load %arg9[%c0_45, %c0_46, %c0_47] : memref<1x16x128xf32, #tpu.memory_space<vmem>>, vector<1x16x128xf32>
    tpu.vector_store %arg9[%c0_45, %c0_46, %c0_47], %54 {strides = array<i32>} : memref<1x16x128xf32, #tpu.memory_space<vmem>>, vector<1x16x128xf32>,
    return
  }
  func.func @transform_0(%arg0: i32) -> (i32, i32, i32) {
    %c0_i32 = arith.constant 0 : i32
    %c0_i32_0 = arith.constant 0 : i32
    %c0_i32_1 = arith.constant 0 : i32
    return %arg0, %c0_i32, %c0_i32_0 : i32, i32, i32
  }
  func.func @transform_1(%arg0: i32) -> (i32, i32, i32) {
    %c0_i32 = arith.constant 0 : i32
    %c0_i32_0 = arith.constant 0 : i32
    %c0_i32_1 = arith.constant 0 : i32
    return %arg0, %c0_i32, %c0_i32_0 : i32, i32, i32
  }
  func.func @transform_2(%arg0: i32) -> (i32, i32) {
    %c0_i32 = arith.constant 0 : i32
    %c0_i32_0 = arith.constant 0 : i32
    %c0_i32_1 = arith.constant 0 : i32
    return %c0_i32, %c0_i32_0 : i32, i32
  }
  func.func @transform_3(%arg0: i32) -> (i32, i32) {
    %c0_i32 = arith.constant 0 : i32
    %c0_i32_0 = arith.constant 0 : i32
    %c0_i32_1 = arith.constant 0 : i32
    return %c0_i32, %c0_i32_0 : i32, i32
  }
  func.func @transform_4(%arg0: i32) -> (i32, i32, i32) {
    %c0_i32 = arith.constant 0 : i32
    %c0_i32_0 = arith.constant 0 : i32
    %c0_i32_1 = arith.constant 0 : i32
    %c0_i32_2 = arith.constant 0 : i32
    return %c0_i32, %c0_i32_0, %c0_i32_1 : i32, i32, i32
  }
  func.func @transform_5(%arg0: i32) -> (i32, i32) {
    %c0_i32 = arith.constant 0 : i32
    %c0_i32_0 = arith.constant 0 : i32
    %c0_i32_1 = arith.constant 0 : i32
    return %c0_i32, %c0_i32_0 : i32, i32
  }
  func.func @transform_6(%arg0: i32) -> (i32, i32, i32) {
    %c0_i32 = arith.constant 0 : i32
    %c0_i32_0 = arith.constant 0 : i32
    %c0_i32_1 = arith.constant 0 : i32
    %c0_i32_2 = arith.constant 0 : i32
    return %c0_i32, %c0_i32_0, %c0_i32_1 : i32, i32, i32
  }
  func.func @transform_7(%arg0: i32) -> (i32, i32) {
    %c0_i32 = arith.constant 0 : i32
    %c0_i32_0 = arith.constant 0 : i32
    %c0_i32_1 = arith.constant 0 : i32
    return %c0_i32, %c0_i32_0 : i32, i32
  }
  func.func @transform_8(%arg0: i32) -> (i32, i32, i32) {
    %c0_i32 = arith.constant 0 : i32
    %c0_i32_0 = arith.constant 0 : i32
    %c0_i32_1 = arith.constant 0 : i32
    return %arg0, %c0_i32, %c0_i32_0 : i32, i32, i32
  }
}

</mosaic_0001>

<bundles_post_ra>
// kernel: tpu_custom_call.1
= control target key start
LH: loop header
LB: loop body
LE: loop exit
PB: predicated region body
PF: predicated region fallthrough
CT: control target
= control target key end

     0   :  { %s3342_s0 = inlined_call_operand.hbm [shape: f32[2,16,64], index: 0, kind: input, shape index: {}]   ;;  %s3343_s1 = inlined_call_operand.hbm [shape: f32[2,16,512], index: 1, kind: input, shape index: {}]   ;;  %s3344_s2 = inlined_call_operand.hbm [shape: f32[16,16], index: 2, kind: input, shape index: {}]   ;;  %s3345_s3 = inlined_call_operand.hbm [shape: f32[16,16], index: 3, kind: input, shape index: {}]   ;;  %s3346_s4 = inlined_call_operand.hbm [shape: f32[3,64,512], index: 4, kind: input, shape index: {}]   ;;  %s3347_s5 = inlined_call_operand.hbm [shape: f32[512,512], index: 5, kind: input, shape index: {}]   ;;  %s3348_s6 = inlined_call_operand.hbm [shape: f32[3,512,128], index: 6, kind: input, shape index: {}]   ;;  %s3349_s7 = inlined_call_operand.vmem [shape: f32[1,128], index: 7, kind: input, shape index: {}]   ;;  %s3350_s8 = inlined_call_operand.hbm [shape: f32[2,16,128], index: 8, kind: output, shape index: {}]  }
   0x1   :  { %3356 = sst [smem:[#allocation23_spill]] %s3344_s2 }
   0x2   :  { %3357 = sst [smem:[#allocation24_spill]] %s3345_s3 }
   0x3   :  { %3358 = sst [smem:[#allocation25_spill]] %s3346_s4 }
   0x4   :  { %3359 = sst [smem:[#allocation26_spill]] %s3347_s5 }
   0x5   :  { %3360 = sst [smem:[#allocation27_spill]] %s3348_s6 }
   0x6   :  { %13 = vsyncpa [#allocation3], 0 }
   0x7   :  { %15 = vsyncpa [#allocation3 + $0x1], 0 }
   0x8   :  { %16 = vsyncpa [#allocation6], 0 }
   0x9   :  { %18 = vsyncpa [#allocation6 + $0x1], 0 }
   0xa   :  { %19 = vsyncpa [#allocation9], 0 }
   0xb   :  { %20 = vsyncpa [#allocation12], 0 }
   0xc   :  { %21 = vsyncpa [#allocation4], 0 }
   0xd   :  { %23 = vsyncpa [#allocation4 + $0x1], 0  ;;  %s2903_s27 = smov 0   ;;  %s2905_s28 = smov 0  }
   0xe   :  { %s2907_s29 = smov 0   ;;  %s2909_s30 = smov 0  }
   0xf LB: > { %3361 = sst [smem:[#allocation21_spill]] %s2841_s29  ;;  %s2927_s12 = sadd.s32 4294967295, %s2845_s30   ;;  %s2845_s30 = sphi %s2909_s30, %s3384_s30   ;;  %s2841_s29 = sphi %s2907_s29, %s3381_s29   ;;  %s2837_s28 = sphi %s2905_s28, %s3383_s28   ;;  %s2833_s27 = sphi %s2903_s27, %s3382_s27  }
  0x10   : > { %s3362_s2 = sld [smem:[#allocation23_spill]]  ;;  %p2330_p0 = scmp.ge.s32.totalorder %s2845_s30, 1 }
  0x11   : > { %p50_p1 = scmp.eq.s32.totalorder %s2927_s12, 0  ;;  %p238_p2 = scmp.lt.s32.totalorder %s2845_s30, 3 }
  0x12   : > { %s2847_s14 = smov [#allocation7]   ;;  %s3364_s3 = sld [smem:[#allocation24_spill]] }
  0x13   : > { %p2932_p3 = pnand %p2330_p0, %p238_p2  ;;  %s251_s15 = sshll.u32 %s2847_s14, 4  ;;  %s252_s15 = int_to_ptr.vmem [resolvable:$true] %s251_s15 }
  0x14   : > { %s2848_s20 = smov [#allocation8]   ;;  %s3353_s22 = smov 128  }
  0x15   : > { %p2434_p4 = pneg %p2932_p3  ;;  %s265_s21 = sshll.u32 %s2848_s20, 4  ;;  %s266_s21 = int_to_ptr.vmem [resolvable:$true] %s265_s21 }
  0x16   : > { %s249_s11 = sshll.u32 %s3362_s2, 4  ;;  %s3354_s23 = smov 8   ;;  %s250_s11 = int_to_ptr.hbm [resolvable:$true] %s249_s11 }
  0x17   : > { %p2944_p6 = pnand %p2434_p4, %p50_p1  ;;  %s3366_s5 = sld [smem:[#allocation26_spill]] }
  0x18   : > { %s263_s18 = sshll.u32 %s3364_s3, 4  ;;  %s2851_s9 = smov [#allocation11]   ;;  %s264_s18 = int_to_ptr.hbm [resolvable:$true] %s263_s18 }
  0x19   : > { %2437 = dma.hbm_to_vmem [thread:$0]  (!%p2944_p6), %s250_s11, 256, %s252_s15, [#allocation6], %s3353_s22, %s3353_s22, %s3354_s23  }
  0x1a   : > { %2440 = dma.hbm_to_vmem [thread:$0]  (!%p2944_p6), %s264_s18, 256, %s266_s21, [#allocation9], %s3353_s22, %s3353_s22, %s3354_s23  }
  0x1b   : > { %s293_s10 = sshll.u32 %s2851_s9, 4  ;;  %s3367_s4 = sld [smem:[#allocation25_spill]]  ;;  %s294_s10 = int_to_ptr.vmem [resolvable:$true] %s293_s10 }
  0x1c   : > { %s3351_s15 = smov 512   ;;  %s3352_s17 = smov 32  }
  0x1d   : > { %s291_s26 = sshll.u32 %s3366_s5, 4  ;;  %s2854_s18 = smov [#allocation10]   ;;  %s292_s26 = int_to_ptr.hbm [resolvable:$true] %s291_s26 }
  0x1e   : > { %2446 = dma.hbm_to_vmem [thread:$0]  (!%p2944_p6), %s292_s26, 32768, %s294_s10, [#allocation12], %s3351_s15, %s3351_s15, %s3352_s17  }
  0x1f   : > { %s279_s20 = sshll.u32 %s2854_s18, 4  ;;  %s3368_s6 = sld [smem:[#allocation27_spill]]  ;;  %s280_s20 = int_to_ptr.vmem [resolvable:$true] %s279_s20 }
  0x20   : > { %s2855_s26 = smov [#allocation13]   ;;  %s2329_s10 = sadd.s32 4294967294, %s2845_s30  }
  0x21   : > { %s277_s11 = sshll.u32 %s3367_s4, 4  ;;  %s307_s9 = sshll.u32 %s2855_s26, 4  ;;  %s278_s11 = int_to_ptr.hbm [resolvable:$true] %s277_s11  ;;  %s308_s9 = int_to_ptr.vmem [resolvable:$true] %s307_s9 }
  0x22   : > { %2443 = dma.hbm_to_vmem [thread:$0]  (!%p2944_p6), %s278_s11, 12288, %s280_s20, [#allocation9], %s3351_s15, %s3351_s15, %s3352_s17  }
  0x23   : > { %s2984_s14 = sadd.s32 1, %s2845_s30   ;;  %s36_s16 = sadd.s32 1, %s2841_s29 }
  0x24   : > { %s33_s18 = ssub.s32 %s2845_s30, %s2984_s14  ;;  %p43_p7 = scmp.ne.s32.totalorder %s2841_s29, %s2837_s28 }
  0x25   : > { %s305_s25 = sshll.u32 %s3368_s6, 4  ;;  %p34_p8 = scmp.eq.s32.totalorder %s33_s18, 0  ;;  %s306_s25 = int_to_ptr.hbm [resolvable:$true] %s305_s25 }
  0x26   : > { %2449 = dma.hbm_to_vmem [thread:$0]  (!%p2944_p6), %s306_s25, 24576, %s308_s9, [#allocation12], %s3353_s22, %s3353_s22, %s3354_s23  }
  0x27   : > { %p44_p9 = scmp.eq.s32.totalorder %s2845_s30, 0  ;;  %p49_p10 = scmp.ne.s32.totalorder %s2837_s28, %s2833_s27 }
  0x28   : > { %p225_p11 = scmp.eq.s32.totalorder %s2927_s12, 1  ;;  %p231_p2 = scmp.eq.s32.totalorder %s2329_s10, 1 }
  0x29   : > { %s2996_s11 = scalar_select %p34_p8, %s2841_s29, %s36_s16  }
  0x2a   : > { %p2998_p12 = por %p44_p9, %p43_p7  ;;  %p3004_p13 = por %p50_p1, %p49_p10 }
  0x2b   : > { %3369 = sst [smem:[#allocation22_spill]] %s2996_s11  ;;  %p3008_p0 = por %p225_p11, %p43_p7 }
  0x2c   : > { %p2466_p4 = scmp.lt.s32.totalorder %s2845_s30, 2  ;;  %s3014_s24 = sand.u32 1, %s2841_s29  }
  0x2d   : > { %p3016_p6 = por %p231_p2, %p49_p10  ;;  %s2337_s26 = sshll.u32 %s3014_s24, 4 }
  0x2e   : > { %s2405_s9 = sshll.u32 %s2845_s30, 4  ;;  %s328_s22 = scalar_lea.vmem [#allocation2], %s2337_s26 }
  0x2f   : > { %s333_s15 = scalar_lea.hbm %s3342_s0, %s2405_s9  ;;  %s336_s23 = sshll.u32 %s328_s22, 4  ;;  %s337_s23 = int_to_ptr.vmem [resolvable:$true] %s336_s23 }
  0x30   : > { %s334_s17 = sshll.u32 %s333_s15, 4  ;;  %p3027_p7 = pnand %p2466_p4, %p2998_p12  ;;  %s335_s17 = int_to_ptr.hbm [resolvable:$true] %s334_s17 }
  0x31   : > { %s346_s2 = sand.u32 1, %s2845_s30   ;;  %s2340_s3 = sshll.u32 %s3014_s24, 6 }
  0x32   : > { %s325_s4 = scalar_lea.sflag [#allocation3], %s3014_s24  ;;  %s2703_s5 = sshra.s32 %s335_s17, 4  ;;  %s2704_s5 = int_to_ptr.hbm [resolvable:$true] %s2703_s5 }
  0x33   : > { %s2705_s6 = scalar_lea.hbm %s2704_s5, 16  ;;  %p2707_p9 = pneg %p3027_p7 }
  0x34   : > { %p2706_p8 = scmp.ne.s32.totalorder %s2704_s5, %s2705_s6  ;;  %s2710_s19 = scalar_lea.hbm %s3342_s0, 32 }
  0x35   : > { %p2711_p12 = scmp.lt.s32.totalorder %s2704_s5, %s3342_s0  ;;  %p2712_p2 = scmp.lt.s32.totalorder %s2710_s19, %s2705_s6 }
  0x36   : > { %p2708_p10 = pnand %p2707_p9, %p2706_p8 }
  0x37   : > { %p2713_p4 = por %p2712_p2, %p2711_p12 }
  0x38   : > { %p2709_p11 = pneg %p2708_p10 }
  0x3a   : > { %p2714_p5 = pnand %p2713_p4, %p2709_p11 }
  0x3c   : > { %2717 = shalt.err (!%p2714_p5)
}
  0x3d   : > { %s3375_s24 = smov 8   ;;  %s3376_s16 = smov 128  }
  0x3e   : > { %2453 = dma.hbm_to_vmem [thread:$0]  (!%p3027_p7), %s335_s17, 256, %s337_s23, %s325_s4, %s3376_s16, %s3376_s16, %s3375_s24  }
  0x3f   : > { %s2406_s18 = sshll.u32 %s2845_s30, 6  ;;  %s350_s11 = scalar_lea.vmem [#allocation5], %s2340_s3 }
  0x40   : > { %s358_s22 = sshll.u32 %s350_s11, 4  ;;  %s355_s26 = scalar_lea.hbm %s3343_s1, %s2406_s18  ;;  %s359_s22 = int_to_ptr.vmem [resolvable:$true] %s358_s22 }
  0x41   : > { %s356_s5 = sshll.u32 %s355_s26, 4  ;;  %s347_s6 = scalar_lea.sflag [#allocation6], %s346_s2  ;;  %s357_s5 = int_to_ptr.hbm [resolvable:$true] %s356_s5 }
  0x42   : > { %s2733_s19 = sshra.s32 %s357_s5, 4  ;;  %s2740_s3 = scalar_lea.hbm %s3343_s1, 128  ;;  %s2734_s19 = int_to_ptr.hbm [resolvable:$true] %s2733_s19 }
  0x43   : > { %s2735_s9 = scalar_lea.hbm %s2734_s19, 64  ;;  %p2741_p11 = scmp.lt.s32.totalorder %s2734_s19, %s3343_s1 }
  0x44   : > { %p2736_p5 = scmp.ne.s32.totalorder %s2734_s19, %s2735_s9  ;;  %p2742_p12 = scmp.lt.s32.totalorder %s2740_s3, %s2735_s9 }
  0x46   : > { %p2738_p8 = pnand %p2736_p5, %p2707_p9  ;;  %p2743_p2 = por %p2742_p12, %p2741_p11 }
  0x48   : > { %p2739_p10 = pneg %p2738_p8 }
  0x4a   : > { %p2744_p4 = pnand %p2743_p2, %p2739_p10 }
  0x4c   : > { %2747 = shalt.err (!%p2744_p4)
}
  0x4d   : > { %s3377_s2 = smov 32   ;;  %s3378_s29 = smov 512  }
  0x4e   : > { %2456 = dma.hbm_to_vmem [thread:$0]  (!%p3027_p7), %s357_s5, 1024, %s359_s22, %s347_s6, %s3378_s29, %s3378_s29, %s3377_s2  }
  0x4f   : > { %370 = sbr.rel (%p2932_p3) target bundleno = 939 (0x3ab), region = 52  ;;  %s3071_s24 = sand.u32 (!%p2932_p3), 1, %s2837_s28  }
  0x50   : > { %s2344_s16 = sshll.u32 (!%p2932_p3), %s3071_s24, 4  ;;  %s373_s18 = scalar_lea.sflag (!%p2932_p3), [#allocation3], %s3071_s24 }
  0x51   : > { %s376_s15 = scalar_lea.vmem (!%p2932_p3), [#allocation2], %s2344_s16 }
  0x54   : > { %2808 = dma.done.wait (%p3004_p13), %s373_s18, 256  }
  0x55   : > { %2810 = vsyncadd (%p3004_p13), %s373_s18, 4294967040  ;;  %s382_s13 = sand.u32 1, %s2927_s12   ;;  %s2345_s10 = sshll.u32 %s3071_s24, 6 }
  0x56   : > { %s383_s22 = scalar_lea.sflag [#allocation6], %s382_s13  ;;  %s3083_s26 = scalar_lea.vmem [#allocation5], %s2345_s10 }
  0x57   : > { %2812 = dma.done.wait (%p3004_p13), %s383_s22, 1024  }
  0x58   : > { %2814 = vsyncadd (%p3004_p13), %s383_s22, 4294966272 }
  0x59   : > { %2816 = dma.done.wait (%p50_p1), [#allocation6], 256  }
  0x5a   : > { %2818 = vsyncadd (%p50_p1), [#allocation6], 4294967040 }
  0x5b   : > { %2820 = dma.done.wait (%p50_p1), [#allocation9], 12544  }
  0x5c   : > { %2822 = vsyncadd (%p50_p1), [#allocation9], 4294954752 }
  0x5d   : > { %2824 = dma.done.wait (%p50_p1), [#allocation12], 57344  }
  0x5e   : > { %2826 = vsyncadd (%p50_p1), [#allocation12], 4294909952  ;;  %v3101_v0 = vld [vmem:[%s376_s15 + $0x8] sm:$0xff]  ;;  %v3103_v1 = vld [vmem:[%s376_s15] sm:$0xff]  ;;  %vm456_vm0 = vcmask 130048   ;;  %vm580_vm1 = vcmask 523264  }
  0x5f   : > { %477 = vmatpush.msra.mxu0 %v3101_v0  ;;  %v452_v2 = vld [vmem:[#allocation7] sm:$0xff]  ;;  %506 = vmatpush.msra.mxu1 %v3101_v0  ;;  %v454_v3 = vld [vmem:[#allocation8] sm:$0xff]  ;;  %v577_v5 = vld [vmem:[#allocation10 + $0x1e8] sm:$0xff]  ;;  %s2407_s6 = sshll.u32 %s2927_s12, 4  ;;  %s449_s23 = scalar_lea.vmem [#allocation14], %s2344_s16 }
  0x60   : > { %v576_v4 = vld [vmem:[#allocation10 + $0x1e0] sm:$0xff]  ;;  %v578_v6 = vld [vmem:[#allocation10 + $0x1f0] sm:$0xff]  ;;  %v579_v7 = vld [vmem:[#allocation10 + $0x1f8] sm:$0xff]  ;;  %618 = vmatpush.msra.mxu3 %v577_v5  ;;  %s2182_s4 = scalar_lea.hbm %s3350_s8, %s2407_s6  ;;  %s2183_s3 = sshll.u32 %s449_s23, 4  ;;  %s2184_s3 = int_to_ptr.vmem [resolvable:$true] %s2183_s3 }
  0x61   : > { %478 = vmatpush.msra.mxu0 %v3103_v1  ;;  %507 = vmatpush.msra.mxu1 %v3103_v1  ;;  %v572_v8 = vld [vmem:[#allocation10 + $0x1c0] sm:$0xff]  ;;  %v573_v9 = vld [vmem:[#allocation10 + $0x1c8] sm:$0xff]  ;;  %v574_v10 = vld [vmem:[#allocation10 + $0x1d0] sm:$0xff]  ;;  %s2185_s17 = sshll.u32 %s2182_s4, 4  ;;  %s2171_s12 = scalar_lea.sflag [#allocation4], %s3071_s24  ;;  %s2186_s17 = int_to_ptr.hbm [resolvable:$true] %s2185_s17 }
  0x62   : > { %2352 = vmatmul.msk.f32.vlgmr.msra.gmra.mxu0 %vm456_vm0, %v452_v2  ;;  %2354 = vmatmul.msk.f32.vlgmr.msra.gmra.mxu1 %vm456_vm0, %v454_v3  ;;  %v575_v11 = vld [vmem:[#allocation10 + $0x1d8] sm:$0xff]  ;;  %v568_v12 = vld [vmem:[#allocation10 + $0x1a0] sm:$0xff]  ;;  %v569_v13 = vld [vmem:[#allocation10 + $0x1a8] sm:$0xff]  ;;  %s2777_s11 = sshra.s32 %s2186_s17, 4  ;;  %s2783_s18 = scalar_lea.hbm %s3350_s8, 32  ;;  %s2778_s11 = int_to_ptr.hbm [resolvable:$true] %s2777_s11 }
  0x63   : > { %595 = vmatpush.msra.mxu2 %v576_v4  ;;  %641 = vmatpush.msrb.mxu0 %v578_v6  ;;  %v570_v14 = vld [vmem:[#allocation10 + $0x1b0] sm:$0xff]  ;;  %v571_v15 = vld [vmem:[#allocation10 + $0x1b8] sm:$0xff]  ;;  %v564_v16 = vld [vmem:[#allocation10 + $0x180] sm:$0xff]  ;;  %s2779_s2 = scalar_lea.hbm %s2778_s11, 16  ;;  %p2784_p7 = scmp.lt.s32.totalorder %s2778_s11, %s3350_s8 }
  0x64   : > { %664 = vmatpush.msrb.mxu1 %v579_v7  ;;  %619 = vmatpush.msra.mxu3 %v573_v9  ;;  %v565_v17 = vld [vmem:[#allocation10 + $0x188] sm:$0xff]  ;;  %v455_v19 = vld [vmem:[#allocation8 + $0x8] sm:$0xff]  ;;  %v566_v20 = vld [vmem:[#allocation10 + $0x190] sm:$0xff]  ;;  %p2780_p1 = scmp.ne.s32.totalorder %s2778_s11, %s2779_s2  ;;  %p2785_p9 = scmp.lt.s32.totalorder %s2783_s18, %s2779_s2 }
  0x65   : > { %596 = vmatpush.msra.mxu2 %v572_v8  ;;  %642 = vmatpush.msrb.mxu0 %v574_v10  ;;  %v453_v18 = vld [vmem:[#allocation7 + $0x8] sm:$0xff]  ;;  %v567_v21 = vld [vmem:[#allocation10 + $0x198] sm:$0xff]  ;;  %v560_v22 = vld [vmem:[#allocation10 + $0x160] sm:$0xff] }
  0x66   : > { %665 = vmatpush.msrb.mxu1 %v575_v11  ;;  %620 = vmatpush.msra.mxu3 %v569_v13  ;;  %v561_v23 = vld [vmem:[#allocation10 + $0x168] sm:$0xff]  ;;  %v562_v24 = vld [vmem:[#allocation10 + $0x170] sm:$0xff]  ;;  %v563_v25 = vld [vmem:[#allocation10 + $0x178] sm:$0xff]  ;;  %p2781_p3 = pnand %p2780_p1, %p3008_p0  ;;  %p2786_p5 = por %p2785_p9, %p2784_p7 }
  0x67   : > { %597 = vmatpush.msra.mxu2 %v568_v12  ;;  %643 = vmatpush.msrb.mxu0 %v570_v14  ;;  %v556_v26 = vld [vmem:[#allocation10 + $0x140] sm:$0xff]  ;;  %v557_v27 = vld [vmem:[#allocation10 + $0x148] sm:$0xff]  ;;  %v558_v28 = vld [vmem:[#allocation10 + $0x150] sm:$0xff] }
  0x68   : > { %666 = vmatpush.msrb.mxu1 %v571_v15  ;;  %621 = vmatpush.msra.mxu3 %v565_v17  ;;  %v559_v29 = vld [vmem:[#allocation10 + $0x158] sm:$0xff]  ;;  %v552_v30 = vld [vmem:[#allocation10 + $0x120] sm:$0xff]  ;;  %v553_v31 = vld [vmem:[#allocation10 + $0x128] sm:$0xff]  ;;  %p2782_p13 = pneg %p2781_p3 }
  0x69   : > { %598 = vmatpush.msra.mxu2 %v564_v16  ;;  %644 = vmatpush.msrb.mxu0 %v566_v20  ;;  %v554_v32 = vld [vmem:[#allocation10 + $0x130] sm:$0xff]  ;;  %v555_v33 = vld [vmem:[#allocation10 + $0x138] sm:$0xff]  ;;  %v548_v34 = vld [vmem:[#allocation10 + $0x100] sm:$0xff] }
  0x6a   : > { %2353 = vmatmul.msk.f32.gmra.mxu0 %vm456_vm0, %v453_v18  ;;  %2355 = vmatmul.msk.f32.gmra.mxu1 %vm456_vm0, %v455_v19  ;;  %v549_v35 = vld [vmem:[#allocation10 + $0x108] sm:$0xff]  ;;  %v550_v36 = vld [vmem:[#allocation10 + $0x110] sm:$0xff]  ;;  %v551_v37 = vld [vmem:[#allocation10 + $0x118] sm:$0xff]  ;;  %p2787_p8 = pnand %p2786_p5, %p2782_p13 }
  0x6b   : > { %667 = vmatpush.msrb.mxu1 %v567_v21  ;;  %599 = vmatpush.msra.mxu2 %v560_v22  ;;  %v543_v38 = vld [vmem:[#allocation10 + $0xe0] sm:$0xff]  ;;  %v544_v39 = vld [vmem:[#allocation10 + $0xe8] sm:$0xff]  ;;  %v545_v40 = vld [vmem:[#allocation10 + $0xf0] sm:$0xff] }
  0x6c   : > { %622 = vmatpush.msra.mxu3 %v561_v23  ;;  %645 = vmatpush.msrb.mxu0 %v562_v24  ;;  %v546_v41 = vld [vmem:[#allocation10 + $0xf8] sm:$0xff]  ;;  %v539_v42 = vld [vmem:[#allocation10 + $0xc0] sm:$0xff]  ;;  %v540_v43 = vld [vmem:[#allocation10 + $0xc8] sm:$0xff] }
  0x6d   : > { %668 = vmatpush.msrb.mxu1 %v563_v25  ;;  %600 = vmatpush.msra.mxu2 %v556_v26  ;;  %v541_v44 = vld [vmem:[#allocation10 + $0xd0] sm:$0xff]  ;;  %v542_v45 = vld [vmem:[#allocation10 + $0xd8] sm:$0xff]  ;;  %v535_v46 = vld [vmem:[#allocation10 + $0xa0] sm:$0xff] }
  0x6e   : > { %623 = vmatpush.msra.mxu3 %v557_v27  ;;  %646 = vmatpush.msrb.mxu0 %v558_v28  ;;  %v536_v47 = vld [vmem:[#allocation10 + $0xa8] sm:$0xff]  ;;  %v537_v48 = vld [vmem:[#allocation10 + $0xb0] sm:$0xff]  ;;  %v538_v49 = vld [vmem:[#allocation10 + $0xb8] sm:$0xff] }
  0x6f   : > { %669 = vmatpush.msrb.mxu1 %v559_v29  ;;  %601 = vmatpush.msra.mxu2 %v552_v30  ;;  %v531_v50 = vld [vmem:[#allocation10 + $0x80] sm:$0xff]  ;;  %v532_v51 = vld [vmem:[#allocation10 + $0x88] sm:$0xff]  ;;  %v533_v52 = vld [vmem:[#allocation10 + $0x90] sm:$0xff] }
  0x70   : > { %624 = vmatpush.msra.mxu3 %v553_v31  ;;  %647 = vmatpush.msrb.mxu0 %v554_v32  ;;  %v534_v53 = vld [vmem:[#allocation10 + $0x98] sm:$0xff]  ;;  %v527_v54 = vld [vmem:[#allocation10 + $0x60] sm:$0xff]  ;;  %v528_v55 = vld [vmem:[#allocation10 + $0x68] sm:$0xff] }
  0x71   : > { %670 = vmatpush.msrb.mxu1 %v555_v33  ;;  %602 = vmatpush.msra.mxu2 %v548_v34  ;;  %v529_v56 = vld [vmem:[#allocation10 + $0x70] sm:$0xff]  ;;  %v530_v57 = vld [vmem:[#allocation10 + $0x78] sm:$0xff]  ;;  %v523_v58 = vld [vmem:[#allocation10 + $0x40] sm:$0xff] }
  0x72   : > { %625 = vmatpush.msra.mxu3 %v549_v35  ;;  %648 = vmatpush.msrb.mxu0 %v550_v36  ;;  %v524_v59 = vld [vmem:[#allocation10 + $0x48] sm:$0xff]  ;;  %v525_v60 = vld [vmem:[#allocation10 + $0x50] sm:$0xff]  ;;  %v526_v61 = vld [vmem:[#allocation10 + $0x58] sm:$0xff] }
  0x73   : > { %671 = vmatpush.msrb.mxu1 %v551_v37  ;;  %2356 = vmatmul.msk.f32.vlgmr.msra.gmra.mxu2 %vm580_vm1, %v3103_v1  ;;  %v519_v62 = vld [vmem:[#allocation10 + $0x20] sm:$0xff]  ;;  %v520_v63 = vld [vmem:[#allocation10 + $0x28] sm:$0xff]  ;;  %v522_v2 = vld [vmem:[#allocation10 + $0x38] sm:$0xff] }
  0x74   : > { %2358 = vmatmul.msk.f32.vlgmr.msra.gmra.mxu3 %vm580_vm1, %v3103_v1  ;;  %2360 = vmatmul.msk.f32.vlgmr.msrb.gmra.mxu0 %vm580_vm1, %v3103_v1  ;;  %v516_v3 = vld [vmem:[#allocation10 + $0x8] sm:$0xff]  ;;  %v517_v4 = vld [vmem:[#allocation10 + $0x10] sm:$0xff]  ;;  %v518_v5 = vld [vmem:[#allocation10 + $0x18] sm:$0xff] }
  0x75   : > { %2362 = vmatmul.msk.f32.vlgmr.msrb.gmra.mxu1 %vm580_vm1, %v3103_v1  ;;  %693 = vmatpush.msrb.mxu2 %v543_v38  ;;  %v521_v1 = vld [vmem:[#allocation10 + $0x30] sm:$0xff]  ;;  %v806_v6 = vld [vmem:[#allocation10 + $0x2e0] sm:$0xff]  ;;  %v807_v7 = vld [vmem:[#allocation10 + $0x2e8] sm:$0xff] }
  0x76   : > { %716 = vmatpush.msrb.mxu3 %v544_v39  ;;  %739 = vmatpush.msra.mxu0 %v545_v40  ;;  %v808_v8 = vld [vmem:[#allocation10 + $0x2f0] sm:$0xff]  ;;  %v809_v9 = vld [vmem:[#allocation10 + $0x2f8] sm:$0xff]  ;;  %v802_v10 = vld [vmem:[#allocation10 + $0x2c0] sm:$0xff] }
  0x77   : > { %762 = vmatpush.msra.mxu1 %v546_v41  ;;  %694 = vmatpush.msrb.mxu2 %v539_v42  ;;  %v803_v11 = vld [vmem:[#allocation10 + $0x2c8] sm:$0xff]  ;;  %v804_v12 = vld [vmem:[#allocation10 + $0x2d0] sm:$0xff]  ;;  %v805_v13 = vld [vmem:[#allocation10 + $0x2d8] sm:$0xff] }
  0x78   : > { %717 = vmatpush.msrb.mxu3 %v540_v43  ;;  %740 = vmatpush.msra.mxu0 %v541_v44  ;;  %v798_v14 = vld [vmem:[#allocation10 + $0x2a0] sm:$0xff]  ;;  %v799_v15 = vld [vmem:[#allocation10 + $0x2a8] sm:$0xff]  ;;  %v800_v16 = vld [vmem:[#allocation10 + $0x2b0] sm:$0xff] }
  0x79   : > { %763 = vmatpush.msra.mxu1 %v542_v45  ;;  %695 = vmatpush.msrb.mxu2 %v535_v46  ;;  %v801_v17 = vld [vmem:[#allocation10 + $0x2b8] sm:$0xff]  ;;  %v794_v18 = vld [vmem:[#allocation10 + $0x280] sm:$0xff]  ;;  %v795_v19 = vld [vmem:[#allocation10 + $0x288] sm:$0xff] }
  0x7a   : > { %718 = vmatpush.msrb.mxu3 %v536_v47  ;;  %741 = vmatpush.msra.mxu0 %v537_v48  ;;  %v796_v20 = vld [vmem:[#allocation10 + $0x290] sm:$0xff]  ;;  %v797_v21 = vld [vmem:[#allocation10 + $0x298] sm:$0xff]  ;;  %v790_v22 = vld [vmem:[#allocation10 + $0x260] sm:$0xff] }
  0x7b   : > { %764 = vmatpush.msra.mxu1 %v538_v49  ;;  %696 = vmatpush.msrb.mxu2 %v531_v50  ;;  %v791_v23 = vld [vmem:[#allocation10 + $0x268] sm:$0xff]  ;;  %v792_v24 = vld [vmem:[#allocation10 + $0x270] sm:$0xff]  ;;  %v793_v25 = vld [vmem:[#allocation10 + $0x278] sm:$0xff] }
  0x7c   : > { %719 = vmatpush.msrb.mxu3 %v532_v51  ;;  %742 = vmatpush.msra.mxu0 %v533_v52  ;;  %v786_v26 = vld [vmem:[#allocation10 + $0x240] sm:$0xff]  ;;  %v787_v27 = vld [vmem:[#allocation10 + $0x248] sm:$0xff]  ;;  %v788_v28 = vld [vmem:[#allocation10 + $0x250] sm:$0xff] }
  0x7d   : > { %765 = vmatpush.msra.mxu1 %v534_v53  ;;  %2357 = vmatmul.msk.f32.gmra.mxu2 %vm580_vm1, %v3101_v0  ;;  %v789_v29 = vld [vmem:[#allocation10 + $0x258] sm:$0xff]  ;;  %v782_v30 = vld [vmem:[#allocation10 + $0x220] sm:$0xff]  ;;  %v783_v31 = vld [vmem:[#allocation10 + $0x228] sm:$0xff] }
  0x7e   : > { %2359 = vmatmul.msk.f32.gmra.mxu3 %vm580_vm1, %v3101_v0  ;;  %2361 = vmatmul.msk.f32.gmra.mxu0 %vm580_vm1, %v3101_v0  ;;  %v784_v32 = vld [vmem:[#allocation10 + $0x230] sm:$0xff]  ;;  %v785_v33 = vld [vmem:[#allocation10 + $0x238] sm:$0xff]  ;;  %v778_v34 = vld [vmem:[#allocation10 + $0x200] sm:$0xff] }
  0x7f   : > { %2363 = vmatmul.msk.f32.gmra.mxu1 %vm580_vm1, %v3101_v0  ;;  %697 = vmatpush.msrb.mxu2 %v527_v54  ;;  %v515_v0 = vld [vmem:[#allocation10] sm:$0xff]  ;;  %v779_v35 = vld [vmem:[#allocation10 + $0x208] sm:$0xff]  ;;  %v780_v36 = vld [vmem:[#allocation10 + $0x210] sm:$0xff] }
  0x80   : > { %720 = vmatpush.msrb.mxu3 %v528_v55  ;;  %743 = vmatpush.msra.mxu0 %v529_v56  ;;  %v781_v37 = vld [vmem:[#allocation10 + $0x218] sm:$0xff]  ;;  %v1152_v39 = vld [vmem:[#allocation11 + $0x5e0] sm:$0xff] }
  0x81   : > { %766 = vmatpush.msra.mxu1 %v530_v57  ;;  %698 = vmatpush.msrb.mxu2 %v523_v58  ;;  %v1216_v40 = vld [vmem:[#allocation11 + $0x7e0] sm:$0xff] }
  0x82   : > { %721 = vmatpush.msrb.mxu3 %v524_v59  ;;  %744 = vmatpush.msra.mxu0 %v525_v60  ;;  %v1024_v41 = vld [vmem:[#allocation11 + $0x1e0] sm:$0xff] }
  0x83   : > { %767 = vmatpush.msra.mxu1 %v526_v61  ;;  %699 = vmatpush.msrb.mxu2 %v519_v62  ;;  %v1088_v42 = vld [vmem:[#allocation11 + $0x3e0] sm:$0xff] }
  0x84   : > { %722 = vmatpush.msrb.mxu3 %v520_v63  ;;  %745 = vmatpush.msra.mxu0 %v521_v1  ;;  %v1148_v43 = vld [vmem:[#allocation11 + $0x5c0] sm:$0xff] }
  0x85   : > { %768 = vmatpush.msra.mxu1 %v522_v2  ;;  %700 = vmatpush.msrb.mxu2 %v515_v0  ;;  %v1212_v44 = vld [vmem:[#allocation11 + $0x7c0] sm:$0xff] }
  0x86   : > { %723 = vmatpush.msrb.mxu3 %v516_v3  ;;  %746 = vmatpush.msra.mxu0 %v517_v4  ;;  %v1020_v45 = vld [vmem:[#allocation11 + $0x1c0] sm:$0xff] }
  0x87   : > { %769 = vmatpush.msra.mxu1 %v518_v5  ;;  %824 = vmatpush.msra.mxu2 %v806_v6  ;;  %v1084_v46 = vld [vmem:[#allocation11 + $0x3c0] sm:$0xff] }
  0x88   : > { %847 = vmatpush.msra.mxu3 %v807_v7  ;;  %870 = vmatpush.msrb.mxu0 %v808_v8  ;;  %v1144_v47 = vld [vmem:[#allocation11 + $0x5a0] sm:$0xff] }
  0x89   : > { %893 = vmatpush.msrb.mxu1 %v809_v9  ;;  %825 = vmatpush.msra.mxu2 %v802_v10  ;;  %v1208_v48 = vld [vmem:[#allocation11 + $0x7a0] sm:$0xff] }
  0x8a   : > { %848 = vmatpush.msra.mxu3 %v803_v11  ;;  %871 = vmatpush.msrb.mxu0 %v804_v12  ;;  %v1016_v49 = vld [vmem:[#allocation11 + $0x1a0] sm:$0xff] }
  0x8b   : > { %894 = vmatpush.msrb.mxu1 %v805_v13  ;;  %826 = vmatpush.msra.mxu2 %v798_v14  ;;  %v1080_v50 = vld [vmem:[#allocation11 + $0x3a0] sm:$0xff] }
  0x8c   : > { %849 = vmatpush.msra.mxu3 %v799_v15  ;;  %872 = vmatpush.msrb.mxu0 %v800_v16  ;;  %v1140_v52 = vld [vmem:[#allocation11 + $0x580] sm:$0xff] }
  0x8d   : > { %895 = vmatpush.msrb.mxu1 %v801_v17  ;;  %827 = vmatpush.msra.mxu2 %v794_v18  ;;  %v1204_v53 = vld [vmem:[#allocation11 + $0x780] sm:$0xff] }
  0x8e   : > { %850 = vmatpush.msra.mxu3 %v795_v19  ;;  %873 = vmatpush.msrb.mxu0 %v796_v20  ;;  %v1012_v54 = vld [vmem:[#allocation11 + $0x180] sm:$0xff] }
  0x8f   : > { %896 = vmatpush.msrb.mxu1 %v797_v21  ;;  %828 = vmatpush.msra.mxu2 %v790_v22  ;;  %v1076_v55 = vld [vmem:[#allocation11 + $0x380] sm:$0xff] }
  0x90   : > { %851 = vmatpush.msra.mxu3 %v791_v23  ;;  %874 = vmatpush.msrb.mxu0 %v792_v24  ;;  %v1136_v56 = vld [vmem:[#allocation11 + $0x560] sm:$0xff] }
  0x91   : > { %897 = vmatpush.msrb.mxu1 %v793_v25  ;;  %829 = vmatpush.msra.mxu2 %v786_v26  ;;  %v1200_v57 = vld [vmem:[#allocation11 + $0x760] sm:$0xff] }
  0x92   : > { %852 = vmatpush.msra.mxu3 %v787_v27  ;;  %875 = vmatpush.msrb.mxu0 %v788_v28  ;;  %v1008_v58 = vld [vmem:[#allocation11 + $0x160] sm:$0xff] }
  0x93   : > { %898 = vmatpush.msrb.mxu1 %v789_v29  ;;  %830 = vmatpush.msra.mxu2 %v782_v30  ;;  %v1072_v59 = vld [vmem:[#allocation11 + $0x360] sm:$0xff] }
  0x94   : > { %853 = vmatpush.msra.mxu3 %v783_v31  ;;  %876 = vmatpush.msrb.mxu0 %v784_v32  ;;  %v1132_v61 = vld [vmem:[#allocation11 + $0x540] sm:$0xff] }
  0x95   : > { %899 = vmatpush.msrb.mxu1 %v785_v33  ;;  %831 = vmatpush.msra.mxu2 %v778_v34  ;;  %v1196_v62 = vld [vmem:[#allocation11 + $0x740] sm:$0xff] }
  0x96   : > { %854 = vmatpush.msra.mxu3 %v779_v35  ;;  %877 = vmatpush.msrb.mxu0 %v780_v36  ;;  %v1004_v63 = vld [vmem:[#allocation11 + $0x140] sm:$0xff]  ;;  %v1153_v36 = vld [vmem:[#allocation11 + $0x5e8] sm:$0xff] }
  0x97   : > { %900 = vmatpush.msrb.mxu1 %v781_v37  ;;  %v1068_v1 = vld [vmem:[#allocation11 + $0x340] sm:$0xff]  ;;  %v1217_v37 = vld [vmem:[#allocation11 + $0x7e8] sm:$0xff] }
  0x98   : > { %v1128_v2 = vld [vmem:[#allocation11 + $0x520] sm:$0xff] }
  0x99   : > { %v1192_v0 = vld [vmem:[#allocation11 + $0x720] sm:$0xff] }
  0x9a   : > { %v1000_v3 = vld [vmem:[#allocation11 + $0x120] sm:$0xff] }
  0x9b   : > { %v1064_v4 = vld [vmem:[#allocation11 + $0x320] sm:$0xff] }
  0x9c   : > { %v1124_v5 = vld [vmem:[#allocation11 + $0x500] sm:$0xff] }
  0x9d   : > { %v1188_v6 = vld [vmem:[#allocation11 + $0x700] sm:$0xff] }
  0x9e   : > { %v996_v7 = vld [vmem:[#allocation11 + $0x100] sm:$0xff] }
  0x9f   : > { %v1060_v8 = vld [vmem:[#allocation11 + $0x300] sm:$0xff] }
  0xa0   : > { %v1120_v9 = vld [vmem:[#allocation11 + $0x4e0] sm:$0xff] }
  0xa1   : > { %v1184_v10 = vld [vmem:[#allocation11 + $0x6e0] sm:$0xff] }
  0xa2   : > { %v992_v11 = vld [vmem:[#allocation11 + $0xe0] sm:$0xff] }
  0xa3   : > { %v1056_v12 = vld [vmem:[#allocation11 + $0x2e0] sm:$0xff] }
  0xa4   : > { %v1116_v14 = vld [vmem:[#allocation11 + $0x4c0] sm:$0xff] }
  0xa5   : > { %v1180_v15 = vld [vmem:[#allocation11 + $0x6c0] sm:$0xff] }
  0xa6   : > { %v988_v16 = vld [vmem:[#allocation11 + $0xc0] sm:$0xff] }
  0xa7   : > { %v1052_v17 = vld [vmem:[#allocation11 + $0x2c0] sm:$0xff] }
  0xa8   : > { %v1112_v18 = vld [vmem:[#allocation11 + $0x4a0] sm:$0xff] }
  0xa9   : > { %v1176_v19 = vld [vmem:[#allocation11 + $0x6a0] sm:$0xff] }
  0xaa   : > { %v984_v20 = vld [vmem:[#allocation11 + $0xa0] sm:$0xff] }
  0xab   : > { %v1048_v21 = vld [vmem:[#allocation11 + $0x2a0] sm:$0xff] }
  0xac   : > { %v1108_v22 = vld [vmem:[#allocation11 + $0x480] sm:$0xff] }
  0xad   : > { %v1172_v23 = vld [vmem:[#allocation11 + $0x680] sm:$0xff] }
  0xae   : > { %v980_v24 = vld [vmem:[#allocation11 + $0x80] sm:$0xff] }
  0xaf   : > { %v1044_v25 = vld [vmem:[#allocation11 + $0x280] sm:$0xff] }
  0xb0   : > { %v1104_v26 = vld [vmem:[#allocation11 + $0x460] sm:$0xff] }
  0xb1   : > { %v1168_v27 = vld [vmem:[#allocation11 + $0x660] sm:$0xff] }
  0xb2   : > { %v1100_v28 = vld [vmem:[#allocation11 + $0x440] sm:$0xff] }
  0xb3   : > { %v1164_v29 = vld [vmem:[#allocation11 + $0x640] sm:$0xff] }
  0xb4   : > { %v1096_v30 = vld [vmem:[#allocation11 + $0x420] sm:$0xff] }
  0xb5   : > { %v1160_v31 = vld [vmem:[#allocation11 + $0x620] sm:$0xff] }
  0xb6   : > { %v976_v32 = vld [vmem:[#allocation11 + $0x60] sm:$0xff] }
  0xb7   : > { %v1040_v33 = vld [vmem:[#allocation11 + $0x260] sm:$0xff] }
  0xb8   : > { %v1092_v34 = vld [vmem:[#allocation11 + $0x400] sm:$0xff] }
  0xb9   : > { %v1156_v35 = vld [vmem:[#allocation11 + $0x600] sm:$0xff] }
  0xdf   : > { %v480_v38 = vpop.f32.mrf.mxu0  ;;  %v509_v60 = vpop.f32.mrf.mxu1 }
  0xe0   : > { %2364 = vmatmul.msk.f32.vlgmr.msrb.gmra.mxu2 %vm580_vm1, %v480_v38  ;;  %2366 = vmatmul.msk.f32.vlgmr.msrb.gmra.mxu3 %vm580_vm1, %v480_v38 }
  0xe1   : > { %2368 = vmatmul.msk.f32.vlgmr.msra.gmra.mxu0 %vm580_vm1, %v480_v38  ;;  %2370 = vmatmul.msk.f32.vlgmr.msra.gmra.mxu1 %vm580_vm1, %v480_v38  ;;  %v972_v38 = vld [vmem:[#allocation11 + $0x40] sm:$0xff] }
  0xe2   : > { %1274 = vmatpush.msra.mxu0 %v1152_v39  ;;  %1297 = vmatpush.msra.mxu1 %v1216_v40  ;;  %v1036_v39 = vld [vmem:[#allocation11 + $0x240] sm:$0xff]  ;;  %v1149_v40 = vld [vmem:[#allocation11 + $0x5c8] sm:$0xff] }
  0xe3   : > { %1228 = vmatpush.msrb.mxu2 %v1024_v41  ;;  %1251 = vmatpush.msrb.mxu3 %v1088_v42  ;;  %v1213_v41 = vld [vmem:[#allocation11 + $0x7c8] sm:$0xff]  ;;  %v968_v42 = vld [vmem:[#allocation11 + $0x20] sm:$0xff] }
  0xe4   : > { %1275 = vmatpush.msra.mxu0 %v1148_v43  ;;  %1298 = vmatpush.msra.mxu1 %v1212_v44  ;;  %v1032_v43 = vld [vmem:[#allocation11 + $0x220] sm:$0xff]  ;;  %v1145_v44 = vld [vmem:[#allocation11 + $0x5a8] sm:$0xff] }
  0xe5   : > { %1229 = vmatpush.msrb.mxu2 %v1020_v45  ;;  %1252 = vmatpush.msrb.mxu3 %v1084_v46  ;;  %v1209_v45 = vld [vmem:[#allocation11 + $0x7a8] sm:$0xff]  ;;  %v964_v46 = vld [vmem:[#allocation11] sm:$0xff] }
  0xe6   : > { %1276 = vmatpush.msra.mxu0 %v1144_v47  ;;  %1299 = vmatpush.msra.mxu1 %v1208_v48  ;;  %v1028_v47 = vld [vmem:[#allocation11 + $0x200] sm:$0xff]  ;;  %v1025_v48 = vld [vmem:[#allocation11 + $0x1e8] sm:$0xff] }
  0xe7   : > { %v483_v51 = vpop.f32.mrf.mxu0  ;;  %1230 = vmatpush.msrb.mxu2 %v1016_v49  ;;  %1253 = vmatpush.msrb.mxu3 %v1080_v50  ;;  %v512_v13 = vpop.f32.mrf.mxu1  ;;  %v1089_v49 = vld [vmem:[#allocation11 + $0x3e8] sm:$0xff] }
  0xe8   : > { %2365 = vmatmul.msk.f32.gmra.mxu2 %vm580_vm1, %v483_v51  ;;  %2367 = vmatmul.msk.f32.gmra.mxu3 %vm580_vm1, %v483_v51  ;;  %v1141_v50 = vld [vmem:[#allocation11 + $0x588] sm:$0xff] }
  0xe9   : > { %2369 = vmatmul.msk.f32.gmra.mxu0 %vm580_vm1, %v483_v51  ;;  %2371 = vmatmul.msk.f32.gmra.mxu1 %vm580_vm1, %v483_v51  ;;  %v1205_v51 = vld [vmem:[#allocation11 + $0x788] sm:$0xff] }
  0xea   : > { %1277 = vmatpush.msra.mxu0 %v1140_v52  ;;  %1300 = vmatpush.msra.mxu1 %v1204_v53  ;;  %v1021_v52 = vld [vmem:[#allocation11 + $0x1c8] sm:$0xff] }
  0xeb   : > { %1231 = vmatpush.msrb.mxu2 %v1012_v54  ;;  %1254 = vmatpush.msrb.mxu3 %v1076_v55  ;;  %v1085_v53 = vld [vmem:[#allocation11 + $0x3c8] sm:$0xff] }
  0xec   : > { %1278 = vmatpush.msra.mxu0 %v1136_v56  ;;  %1301 = vmatpush.msra.mxu1 %v1200_v57  ;;  %v1137_v54 = vld [vmem:[#allocation11 + $0x568] sm:$0xff] }
  0xed   : > { %1232 = vmatpush.msrb.mxu2 %v1008_v58  ;;  %1255 = vmatpush.msrb.mxu3 %v1072_v59  ;;  %v1201_v55 = vld [vmem:[#allocation11 + $0x768] sm:$0xff] }
  0xee   : > { %1279 = vmatpush.msra.mxu0 %v1132_v61  ;;  %1302 = vmatpush.msra.mxu1 %v1196_v62  ;;  %v1017_v56 = vld [vmem:[#allocation11 + $0x1a8] sm:$0xff] }
  0xef   : > { %1233 = vmatpush.msrb.mxu2 %v1004_v63  ;;  %1256 = vmatpush.msrb.mxu3 %v1068_v1  ;;  %v1081_v57 = vld [vmem:[#allocation11 + $0x3a8] sm:$0xff] }
  0xf0   : > { %2372 = vmatmul.msk.f32.vlgmr.msra.gmra.mxu2 %vm580_vm1, %v509_v60  ;;  %2374 = vmatmul.msk.f32.vlgmr.msra.gmra.mxu3 %vm580_vm1, %v509_v60  ;;  %v1133_v58 = vld [vmem:[#allocation11 + $0x548] sm:$0xff] }
  0xf1   : > { %2376 = vmatmul.msk.f32.vlgmr.msrb.gmra.mxu0 %vm580_vm1, %v509_v60  ;;  %2378 = vmatmul.msk.f32.vlgmr.msrb.gmra.mxu1 %vm580_vm1, %v509_v60  ;;  %v1197_v59 = vld [vmem:[#allocation11 + $0x748] sm:$0xff]  ;;  %v3145_v60 = vpop.f32.mrf.mxu0 }
  0xf2   : > { %1280 = vmatpush.msra.mxu0 %v1128_v2  ;;  %1303 = vmatpush.msra.mxu1 %v1192_v0  ;;  %v3147_v61 = vpop.f32.mrf.mxu1  ;;  %v1013_v62 = vld [vmem:[#allocation11 + $0x188] sm:$0xff] }
  0xf3   : > { %1234 = vmatpush.msrb.mxu2 %v1000_v3  ;;  %1257 = vmatpush.msrb.mxu3 %v1064_v4  ;;  %v1077_v63 = vld [vmem:[#allocation11 + $0x388] sm:$0xff] }
  0xf4   : > { %1281 = vmatpush.msra.mxu0 %v1124_v5  ;;  %1304 = vmatpush.msra.mxu1 %v1188_v6  ;;  %v1129_v1 = vld [vmem:[#allocation11 + $0x528] sm:$0xff] }
  0xf5   : > { %1235 = vmatpush.msrb.mxu2 %v996_v7  ;;  %1258 = vmatpush.msrb.mxu3 %v1060_v8  ;;  %v1193_v2 = vld [vmem:[#allocation11 + $0x728] sm:$0xff] }
  0xf6   : > { %1282 = vmatpush.msra.mxu0 %v1120_v9  ;;  %1305 = vmatpush.msra.mxu1 %v1184_v10  ;;  %v1009_v0 = vld [vmem:[#allocation11 + $0x168] sm:$0xff]  ;;  %v3149_v5 = vpop.f32.mrf.mxu2 }
  0xf7   : > { %1236 = vmatpush.msrb.mxu2 %v992_v11  ;;  %1259 = vmatpush.msrb.mxu3 %v1056_v12  ;;  %v1073_v3 = vld [vmem:[#allocation11 + $0x368] sm:$0xff]  ;;  %v3151_v6 = vpop.f32.mrf.mxu3 }
  0xf8   : > { %2373 = vmatmul.msk.f32.gmra.mxu2 %vm580_vm1, %v512_v13  ;;  %2375 = vmatmul.msk.f32.gmra.mxu3 %vm580_vm1, %v512_v13  ;;  %v1125_v4 = vld [vmem:[#allocation11 + $0x508] sm:$0xff] }
  0xf9   : > { %2377 = vmatmul.msk.f32.gmra.mxu0 %vm580_vm1, %v512_v13  ;;  %2379 = vmatmul.msk.f32.gmra.mxu1 %vm580_vm1, %v512_v13  ;;  %v1189_v7 = vld [vmem:[#allocation11 + $0x708] sm:$0xff] }
  0xfa   : > { %1283 = vmatpush.msra.mxu0 %v1116_v14  ;;  %1306 = vmatpush.msra.mxu1 %v1180_v15  ;;  %v1005_v8 = vld [vmem:[#allocation11 + $0x148] sm:$0xff] }
  0xfb   : > { %1237 = vmatpush.msrb.mxu2 %v988_v16  ;;  %1260 = vmatpush.msrb.mxu3 %v1052_v17  ;;  %v1069_v9 = vld [vmem:[#allocation11 + $0x348] sm:$0xff]  ;;  %v3153_v16 = vpop.f32.mrf.mxu0 }
  0xfc   : > { %1284 = vmatpush.msra.mxu0 %v1112_v18  ;;  %1307 = vmatpush.msra.mxu1 %v1176_v19  ;;  %v1121_v10 = vld [vmem:[#allocation11 + $0x4e8] sm:$0xff]  ;;  %v3155_v17 = vpop.f32.mrf.mxu1 }
  0xfd   : > { %1238 = vmatpush.msrb.mxu2 %v984_v20  ;;  %1261 = vmatpush.msrb.mxu3 %v1048_v21  ;;  %v1185_v11 = vld [vmem:[#allocation11 + $0x6e8] sm:$0xff] }
  0xfe   : > { %1285 = vmatpush.msra.mxu0 %v1108_v22  ;;  %1308 = vmatpush.msra.mxu1 %v1172_v23  ;;  %v1001_v12 = vld [vmem:[#allocation11 + $0x128] sm:$0xff] }
  0xff   : > { %1239 = vmatpush.msrb.mxu2 %v980_v24  ;;  %1262 = vmatpush.msrb.mxu3 %v1044_v25  ;;  %v1065_v13 = vld [vmem:[#allocation11 + $0x328] sm:$0xff] }
 0x100   : > { %1286 = vmatpush.msra.mxu0 %v1104_v26  ;;  %1309 = vmatpush.msra.mxu1 %v1168_v27  ;;  %v1117_v14 = vld [vmem:[#allocation11 + $0x4c8] sm:$0xff] }
 0x101   : > { %1240 = vmatpush.msrb.mxu2 %v976_v32  ;;  %1263 = vmatpush.msrb.mxu3 %v1040_v33  ;;  %v1181_v15 = vld [vmem:[#allocation11 + $0x6c8] sm:$0xff] }
 0x102   : > { %1287 = vmatpush.msra.mxu0 %v1100_v28  ;;  %1310 = vmatpush.msra.mxu1 %v1164_v29  ;;  %v997_v18 = vld [vmem:[#allocation11 + $0x108] sm:$0xff]  ;;  %v3157_v29 = vpop.f32.mrf.mxu2 }
 0x103   : > { %1241 = vmatpush.msrb.mxu2 %v972_v38  ;;  %1264 = vmatpush.msrb.mxu3 %v1036_v39  ;;  %v1061_v19 = vld [vmem:[#allocation11 + $0x308] sm:$0xff] }
 0x104   : > { %1288 = vmatpush.msra.mxu0 %v1096_v30  ;;  %1311 = vmatpush.msra.mxu1 %v1160_v31  ;;  %v1113_v20 = vld [vmem:[#allocation11 + $0x4a8] sm:$0xff]  ;;  %v3159_v30 = vpop.f32.mrf.mxu3 }
 0x105   : > { %1242 = vmatpush.msrb.mxu2 %v968_v42  ;;  %1265 = vmatpush.msrb.mxu3 %v1032_v43  ;;  %v1177_v21 = vld [vmem:[#allocation11 + $0x6a8] sm:$0xff] }
 0x106   : > { %1289 = vmatpush.msra.mxu0 %v1092_v34  ;;  %1312 = vmatpush.msra.mxu1 %v1156_v35  ;;  %v993_v22 = vld [vmem:[#allocation11 + $0xe8] sm:$0xff] }
 0x107   : > { %1243 = vmatpush.msrb.mxu2 %v964_v46  ;;  %1266 = vmatpush.msrb.mxu3 %v1028_v47  ;;  %v1057_v23 = vld [vmem:[#allocation11 + $0x2e8] sm:$0xff] }
 0x108   : > { %1366 = vmatpush.msrb.mxu0 %v1153_v36  ;;  %1389 = vmatpush.msrb.mxu1 %v1217_v37  ;;  %v1109_v24 = vld [vmem:[#allocation11 + $0x488] sm:$0xff] }
 0x109   : > { %1320 = vmatpush.msra.mxu2 %v1025_v48  ;;  %1343 = vmatpush.msra.mxu3 %v1089_v49  ;;  %v1173_v25 = vld [vmem:[#allocation11 + $0x688] sm:$0xff] }
 0x10a   : > { %1367 = vmatpush.msrb.mxu0 %v1149_v40  ;;  %1390 = vmatpush.msrb.mxu1 %v1213_v41  ;;  %v989_v26 = vld [vmem:[#allocation11 + $0xc8] sm:$0xff] }
 0x10b   : > { %1321 = vmatpush.msra.mxu2 %v1021_v52  ;;  %1344 = vmatpush.msra.mxu3 %v1085_v53  ;;  %v1053_v27 = vld [vmem:[#allocation11 + $0x2c8] sm:$0xff] }
 0x10c   : > { %1368 = vmatpush.msrb.mxu0 %v1145_v44  ;;  %1391 = vmatpush.msrb.mxu1 %v1209_v45  ;;  %v1105_v28 = vld [vmem:[#allocation11 + $0x468] sm:$0xff] }
 0x10d   : > { %1322 = vmatpush.msra.mxu2 %v1017_v56  ;;  %1345 = vmatpush.msra.mxu3 %v1081_v57  ;;  %v1169_v31 = vld [vmem:[#allocation11 + $0x668] sm:$0xff] }
 0x10e   : > { %1369 = vmatpush.msrb.mxu0 %v1141_v50  ;;  %1392 = vmatpush.msrb.mxu1 %v1205_v51  ;;  %v985_v32 = vld [vmem:[#allocation11 + $0xa8] sm:$0xff] }
 0x10f   : > { %1323 = vmatpush.msra.mxu2 %v1013_v62  ;;  %1346 = vmatpush.msra.mxu3 %v1077_v63  ;;  %v1049_v33 = vld [vmem:[#allocation11 + $0x2a8] sm:$0xff] }
 0x110   : > { %1370 = vmatpush.msrb.mxu0 %v1137_v54  ;;  %1393 = vmatpush.msrb.mxu1 %v1201_v55  ;;  %v1101_v34 = vld [vmem:[#allocation11 + $0x448] sm:$0xff] }
 0x111   : > { %1324 = vmatpush.msra.mxu2 %v1009_v0  ;;  %1347 = vmatpush.msra.mxu3 %v1073_v3  ;;  %v1165_v35 = vld [vmem:[#allocation11 + $0x648] sm:$0xff] }
 0x112   : > { %1371 = vmatpush.msrb.mxu0 %v1133_v58  ;;  %1394 = vmatpush.msrb.mxu1 %v1197_v59  ;;  %v981_v36 = vld [vmem:[#allocation11 + $0x88] sm:$0xff] }
 0x113   : > { %1325 = vmatpush.msra.mxu2 %v1005_v8  ;;  %1348 = vmatpush.msra.mxu3 %v1069_v9  ;;  %v1045_v37 = vld [vmem:[#allocation11 + $0x288] sm:$0xff] }
 0x114   : > { %1372 = vmatpush.msrb.mxu0 %v1129_v1  ;;  %1395 = vmatpush.msrb.mxu1 %v1193_v2  ;;  %v1097_v38 = vld [vmem:[#allocation11 + $0x428] sm:$0xff] }
 0x115   : > { %1326 = vmatpush.msra.mxu2 %v1001_v12  ;;  %1349 = vmatpush.msra.mxu3 %v1065_v13  ;;  %v1161_v39 = vld [vmem:[#allocation11 + $0x628] sm:$0xff] }
 0x116   : > { %1373 = vmatpush.msrb.mxu0 %v1125_v4  ;;  %1396 = vmatpush.msrb.mxu1 %v1189_v7  ;;  %v977_v42 = vld [vmem:[#allocation11 + $0x68] sm:$0xff] }
 0x117   : > { %1327 = vmatpush.msra.mxu2 %v997_v18  ;;  %1350 = vmatpush.msra.mxu3 %v1061_v19  ;;  %v1041_v43 = vld [vmem:[#allocation11 + $0x268] sm:$0xff] }
 0x118   : > { %1374 = vmatpush.msrb.mxu0 %v1121_v10  ;;  %1397 = vmatpush.msrb.mxu1 %v1185_v11  ;;  %v1093_v44 = vld [vmem:[#allocation11 + $0x408] sm:$0xff] }
 0x119   : > { %1328 = vmatpush.msra.mxu2 %v993_v22  ;;  %1351 = vmatpush.msra.mxu3 %v1057_v23  ;;  %v1157_v45 = vld [vmem:[#allocation11 + $0x608] sm:$0xff] }
 0x11a   : > { %1375 = vmatpush.msrb.mxu0 %v1117_v14  ;;  %1398 = vmatpush.msrb.mxu1 %v1181_v15  ;;  %v973_v46 = vld [vmem:[#allocation11 + $0x48] sm:$0xff] }
 0x11b   : > { %1329 = vmatpush.msra.mxu2 %v989_v26  ;;  %1352 = vmatpush.msra.mxu3 %v1053_v27  ;;  %v1037_v47 = vld [vmem:[#allocation11 + $0x248] sm:$0xff] }
 0x11c   : > { %1376 = vmatpush.msrb.mxu0 %v1113_v20  ;;  %1399 = vmatpush.msrb.mxu1 %v1177_v21  ;;  %v969_v50 = vld [vmem:[#allocation11 + $0x28] sm:$0xff] }
 0x11d   : > { %1330 = vmatpush.msra.mxu2 %v985_v32  ;;  %1353 = vmatpush.msra.mxu3 %v1049_v33  ;;  %v1033_v51 = vld [vmem:[#allocation11 + $0x228] sm:$0xff] }
 0x11e   : > { %1377 = vmatpush.msrb.mxu0 %v1109_v24  ;;  %1400 = vmatpush.msrb.mxu1 %v1173_v25  ;;  %v965_v52 = vld [vmem:[#allocation11 + $0x8] sm:$0xff] }
 0x11f   : > { %1331 = vmatpush.msra.mxu2 %v981_v36  ;;  %1354 = vmatpush.msra.mxu3 %v1045_v37  ;;  %v1029_v53 = vld [vmem:[#allocation11 + $0x208] sm:$0xff]  ;;  %v1218_v36 = vld [vmem:[#allocation11 + $0x7f0] sm:$0xff] }
 0x120   : > { %1378 = vmatpush.msrb.mxu0 %v1105_v28  ;;  %1401 = vmatpush.msrb.mxu1 %v1169_v31 }
 0x121   : > { %1332 = vmatpush.msra.mxu2 %v977_v42  ;;  %1355 = vmatpush.msra.mxu3 %v1041_v43  ;;  %v1150_v42 = vld [vmem:[#allocation11 + $0x5d0] sm:$0xff] }
 0x122   : > { %1379 = vmatpush.msrb.mxu0 %v1101_v34  ;;  %1402 = vmatpush.msrb.mxu1 %v1165_v35  ;;  %v1214_v43 = vld [vmem:[#allocation11 + $0x7d0] sm:$0xff] }
 0x123   : > { %1333 = vmatpush.msra.mxu2 %v973_v46  ;;  %1356 = vmatpush.msra.mxu3 %v1037_v47 }
 0x124   : > { %1380 = vmatpush.msrb.mxu0 %v1097_v38  ;;  %1403 = vmatpush.msrb.mxu1 %v1161_v39 }
 0x125   : > { %1334 = vmatpush.msra.mxu2 %v969_v50  ;;  %1357 = vmatpush.msra.mxu3 %v1033_v51 }
 0x126   : > { %1381 = vmatpush.msrb.mxu0 %v1093_v44  ;;  %1404 = vmatpush.msrb.mxu1 %v1157_v45 }
 0x127   : > { %1335 = vmatpush.msra.mxu2 %v965_v52  ;;  %1358 = vmatpush.msra.mxu3 %v1029_v53  ;;  %v1026_v52 = vld [vmem:[#allocation11 + $0x1f0] sm:$0xff] }
 0x15e   : > { %v748_v40 = vpop.f32.mrf.mxu0  ;;  %v771_v41 = vpop.f32.mrf.mxu1 }
 0x15f   : > { %v749_v58 = vadd.f32 %v748_v40, %v3145_v60  ;;  %v772_v59 = vadd.f32 %v771_v41, %v3147_v61 }
 0x163   : > { %v702_v48 = vpop.f32.mrf.mxu2  ;;  %v725_v49 = vpop.f32.mrf.mxu3 }
 0x164   : > { %v703_v4 = vadd.f32 %v702_v48, %v3149_v5  ;;  %v726_v7 = vadd.f32 %v725_v49, %v3151_v6  ;;  %v1146_v48 = vld [vmem:[#allocation11 + $0x5b0] sm:$0xff] }
 0x165   : > { %v1210_v49 = vld [vmem:[#allocation11 + $0x7b0] sm:$0xff] }
 0x166   : > { %v751_v54 = vpop.f32.mrf.mxu0  ;;  %v774_v55 = vpop.f32.mrf.mxu1 }
 0x167   : > { %v752_v60 = vadd.f32 %v751_v54, %v3153_v16  ;;  %v775_v61 = vadd.f32 %v774_v55, %v3155_v17 }
 0x16b   : > { %v705_v56 = vpop.f32.mrf.mxu2  ;;  %v728_v57 = vpop.f32.mrf.mxu3 }
 0x16c   : > { %v706_v23 = vadd.f32 %v705_v56, %v3157_v29  ;;  %v729_v16 = vadd.f32 %v728_v57, %v3159_v30  ;;  %v1154_v30 = vld [vmem:[#allocation11 + $0x5f0] sm:$0xff] }
 0x16d   : > { %v1090_v56 = vld [vmem:[#allocation11 + $0x3f0] sm:$0xff] }
 0x16e   : > { %v879_v62 = vpop.f32.mrf.mxu0  ;;  %v902_v63 = vpop.f32.mrf.mxu1  ;;  %v1142_v57 = vld [vmem:[#allocation11 + $0x590] sm:$0xff] }
 0x16f   : > { %v910_v1 = vadd.f32 %v879_v62, %v749_v58  ;;  %v911_v2 = vadd.f32 %v902_v63, %v772_v59  ;;  %v1206_v59 = vld [vmem:[#allocation11 + $0x790] sm:$0xff] }
 0x170   : > { %v1022_v63 = vld [vmem:[#allocation11 + $0x1d0] sm:$0xff] }
 0x171   : > { %v926_v0 = vmin.f32 %v910_v1, 0.0  ;;  %v927_v3 = vmin.f32 %v911_v2, 0.0  ;;  %vm918_vm2 = vcmp.gt.f32.partialorder %v910_v1, 0.0  ;;  %vm919_vm3 = vcmp.gt.f32.partialorder %v911_v2, 0.0 }
 0x173   : > { %v936_v8 = vmul.f32 1.442695, %v926_v0  ;;  %v938_v9 = vmul.f32 1.442695, %v927_v3  ;;  %v833_v10 = vpop.f32.mrf.mxu2  ;;  %v856_v11 = vpop.f32.mrf.mxu3  ;;  %v1138_v0 = vld [vmem:[#allocation11 + $0x570] sm:$0xff] }
 0x174   : > { %v908_v12 = vadd.f32 %v833_v10, %v703_v4  ;;  %v3165_v13 = vadd.f32 %v856_v11, %v726_v7  ;;  %v1202_v4 = vld [vmem:[#allocation11 + $0x770] sm:$0xff] }
 0x175   : > { %2517 = vpow2.f32 %v936_v8  ;;  %v1018_v7 = vld [vmem:[#allocation11 + $0x1b0] sm:$0xff] }
 0x176   : > { %2519 = vpow2.f32 %v938_v9  ;;  %v924_v14 = vmin.f32 %v908_v12, 0.0  ;;  %v882_v15 = vpop.f32.mrf.mxu0  ;;  %v905_v18 = vpop.f32.mrf.mxu1  ;;  %v925_v5 = vmin.f32 %v3165_v13, 0.0  ;;  %vm916_vm4 = vcmp.gt.f32.partialorder %v908_v12, 0.0  ;;  %v1082_v10 = vld [vmem:[#allocation11 + $0x3b0] sm:$0xff] }
 0x177   : > { %v3170_v19 = vadd.f32 %v882_v15, %v752_v60  ;;  %v3172_v6 = vadd.f32 %v905_v18, %v775_v61  ;;  %vm917_vm5 = vcmp.gt.f32.partialorder %v3165_v13, 0.0  ;;  %v1134_v11 = vld [vmem:[#allocation11 + $0x550] sm:$0xff] }
 0x178   : > { %v932_v20 = vmul.f32 1.442695, %v924_v14  ;;  %v934_v21 = vmul.f32 1.442695, %v925_v5  ;;  %v1014_v60 = vld [vmem:[#allocation11 + $0x190] sm:$0xff] }
 0x179   : > { %v930_v22 = vmin.f32 %v3170_v19, 0.0  ;;  %v931_v17 = vmin.f32 %v3172_v6, 0.0  ;;  %vm922_vm6 = vcmp.gt.f32.partialorder %v3170_v19, 0.0  ;;  %vm923_vm7 = vcmp.gt.f32.partialorder %v3172_v6, 0.0  ;;  %v1078_v61 = vld [vmem:[#allocation11 + $0x390] sm:$0xff] }
 0x17a   : > { %2521 = vpow2.f32 %v932_v20  ;;  %v1130_v14 = vld [vmem:[#allocation11 + $0x530] sm:$0xff] }
 0x17b   : > { %v2518_v24 = vpop.eup %2517  ;;  %2523 = vpow2.f32 %v934_v21  ;;  %v944_v25 = vmul.f32 1.442695, %v930_v22  ;;  %v836_v26 = vpop.f32.mrf.mxu2  ;;  %v946_v32 = vmul.f32 1.442695, %v931_v17  ;;  %v1194_v15 = vld [vmem:[#allocation11 + $0x730] sm:$0xff] }
 0x17c   : > { %v859_v27 = vpop.f32.mrf.mxu3  ;;  %v2520_v28 = vpop.eup %2519  ;;  %v2382_v31 = vadd.f32 -1.0, %v2518_v24  ;;  %v3178_v33 = vadd.f32 %v836_v26, %v706_v23  ;;  %v1126_v20 = vld [vmem:[#allocation11 + $0x510] sm:$0xff] }
 0x17d   : > { %v3180_v34 = vadd.f32 %v859_v27, %v729_v16  ;;  %v2383_v35 = vadd.f32 -1.0, %v2520_v28  ;;  %2525 = vpow2.f32 %v944_v25  ;;  %v1190_v21 = vld [vmem:[#allocation11 + $0x710] sm:$0xff] }
 0x17e   : > { %2527 = vpow2.f32 %v946_v32  ;;  %v928_v29 = vmin.f32 %v3178_v33, 0.0  ;;  %v3184_v38 = vsel %vm918_vm2, %v910_v1, %v2382_v31  ;;  %vm920_vm8 = vcmp.gt.f32.partialorder %v3178_v33, 0.0  ;;  %v1006_v22 = vld [vmem:[#allocation11 + $0x150] sm:$0xff] }
 0x17f   : > { %v929_v37 = vmin.f32 %v3180_v34, 0.0  ;;  %v3186_v39 = vsel %vm919_vm3, %v911_v2, %v2383_v35  ;;  %1290 = vmatmul.f32.vlgmr.msra.gmra.mxu0 %v3184_v38  ;;  %v1086_v2 = vld [vmem:[#allocation11 + $0x3d0] sm:$0xff]  ;;  %vm921_vm9 = vcmp.gt.f32.partialorder %v3180_v34, 0.0 }
 0x180   : > { %v2522_v40 = vpop.eup %2521  ;;  %v940_v41 = vmul.f32 1.442695, %v928_v29  ;;  %1313 = vmatmul.f32.vlgmr.msra.gmra.mxu1 %v3186_v39  ;;  %1458 = vmatpush.msra.mxu0 %v1154_v30  ;;  %v1070_v23 = vld [vmem:[#allocation11 + $0x350] sm:$0xff] }
 0x181   : > { %v2524_v44 = vpop.eup %2523  ;;  %v2380_v45 = vadd.f32 -1.0, %v2522_v40  ;;  %v942_v46 = vmul.f32 1.442695, %v929_v37  ;;  %1481 = vmatpush.msra.mxu1 %v1218_v36  ;;  %v1122_v16 = vld [vmem:[#allocation11 + $0x4f0] sm:$0xff] }
 0x182   : > { %v2381_v47 = vadd.f32 -1.0, %v2524_v44  ;;  %2529 = vpow2.f32 %v940_v41  ;;  %1459 = vmatpush.msra.mxu0 %v1150_v42  ;;  %v1186_v17 = vld [vmem:[#allocation11 + $0x6f0] sm:$0xff] }
 0x183   : > { %v2526_v50 = vpop.eup %2525  ;;  %2531 = vpow2.f32 %v942_v46  ;;  %1482 = vmatpush.msra.mxu1 %v1214_v43  ;;  %v3191_v51 = vsel %vm916_vm4, %v908_v12, %v2380_v45  ;;  %v1002_v24 = vld [vmem:[#allocation11 + $0x130] sm:$0xff] }
 0x184   : > { %v2528_v53 = vpop.eup %2527  ;;  %v2386_v54 = vadd.f32 -1.0, %v2526_v50  ;;  %1244 = vmatmul.f32.vlgmr.msrb.gmra.mxu2 %v3191_v51  ;;  %v3195_v55 = vsel %vm917_vm5, %v3165_v13, %v2381_v47  ;;  %1460 = vmatpush.msra.mxu0 %v1146_v48  ;;  %v1198_v13 = vld [vmem:[#allocation11 + $0x750] sm:$0xff] }
 0x185   : > { %v2387_v58 = vadd.f32 -1.0, %v2528_v53  ;;  %1483 = vmatpush.msra.mxu1 %v1210_v49  ;;  %1267 = vmatmul.f32.vlgmr.msrb.gmra.mxu3 %v3195_v55  ;;  %v1066_v25 = vld [vmem:[#allocation11 + $0x330] sm:$0xff] }
 0x186   : > { %1412 = vmatpush.msrb.mxu2 %v1026_v52  ;;  %v3201_v62 = vsel %vm922_vm6, %v3170_v19, %v2386_v54  ;;  %1435 = vmatpush.msrb.mxu3 %v1090_v56  ;;  %v1010_v19 = vld [vmem:[#allocation11 + $0x170] sm:$0xff]  ;;  %v1155_v56 = vld [vmem:[#allocation11 + $0x5f8] sm:$0xff] }
 0x187   : > { %1461 = vmatpush.msra.mxu0 %v1142_v57  ;;  %v3204_v1 = vsel %vm923_vm7, %v3172_v6, %v2387_v58  ;;  %1484 = vmatpush.msra.mxu1 %v1206_v59  ;;  %v1074_v6 = vld [vmem:[#allocation11 + $0x370] sm:$0xff]  ;;  %v1219_v57 = vld [vmem:[#allocation11 + $0x7f8] sm:$0xff] }
 0x188   : > { %v2530_v3 = vpop.eup %2529  ;;  %1293 = vmatmul.f32.gmra.mxu0 %v3201_v62  ;;  %1316 = vmatmul.f32.gmra.mxu1 %v3204_v1  ;;  %v1118_v26 = vld [vmem:[#allocation11 + $0x4d0] sm:$0xff] }
 0x189   : > { %v2532_v8 = vpop.eup %2531  ;;  %v2384_v9 = vadd.f32 -1.0, %v2530_v3  ;;  %1413 = vmatpush.msrb.mxu2 %v1022_v63  ;;  %1436 = vmatpush.msrb.mxu3 %v1086_v2  ;;  %v1182_v27 = vld [vmem:[#allocation11 + $0x6d0] sm:$0xff]  ;;  %v1151_v63 = vld [vmem:[#allocation11 + $0x5d8] sm:$0xff] }
 0x18a   : > { %v2385_v12 = vadd.f32 -1.0, %v2532_v8  ;;  %1462 = vmatpush.msra.mxu0 %v1138_v0  ;;  %1485 = vmatpush.msra.mxu1 %v1202_v4  ;;  %v998_v28 = vld [vmem:[#allocation11 + $0x110] sm:$0xff]  ;;  %v1215_v2 = vld [vmem:[#allocation11 + $0x7d8] sm:$0xff] }
 0x18b   : > { %1414 = vmatpush.msrb.mxu2 %v1018_v7  ;;  %1437 = vmatpush.msrb.mxu3 %v1082_v10  ;;  %v3211_v18 = vsel %vm920_vm8, %v3178_v33, %v2384_v9  ;;  %v1062_v31 = vld [vmem:[#allocation11 + $0x310] sm:$0xff]  ;;  %v1147_v4 = vld [vmem:[#allocation11 + $0x5b8] sm:$0xff] }
 0x18c   : > { %1463 = vmatpush.msra.mxu0 %v1134_v11  ;;  %1486 = vmatpush.msra.mxu1 %v1198_v13  ;;  %v3214_v5 = vsel %vm921_vm9, %v3180_v34, %v2385_v12  ;;  %v1114_v32 = vld [vmem:[#allocation11 + $0x4b0] sm:$0xff]  ;;  %v1211_v7 = vld [vmem:[#allocation11 + $0x7b8] sm:$0xff] }
 0x18d   : > { %1415 = vmatpush.msrb.mxu2 %v1014_v60  ;;  %1438 = vmatpush.msrb.mxu3 %v1078_v61  ;;  %v1178_v33 = vld [vmem:[#allocation11 + $0x6b0] sm:$0xff]  ;;  %v1027_v10 = vld [vmem:[#allocation11 + $0x1f8] sm:$0xff] }
 0x18e   : > { %1464 = vmatpush.msra.mxu0 %v1130_v14  ;;  %1487 = vmatpush.msra.mxu1 %v1194_v15  ;;  %v994_v34 = vld [vmem:[#allocation11 + $0xf0] sm:$0xff]  ;;  %v1091_v11 = vld [vmem:[#allocation11 + $0x3f8] sm:$0xff] }
 0x18f   : > { %1247 = vmatmul.f32.gmra.mxu2 %v3211_v18  ;;  %1270 = vmatmul.f32.gmra.mxu3 %v3214_v5  ;;  %v1058_v35 = vld [vmem:[#allocation11 + $0x2f0] sm:$0xff]  ;;  %v1143_v12 = vld [vmem:[#allocation11 + $0x598] sm:$0xff] }
 0x190   : > { %1416 = vmatpush.msrb.mxu2 %v1010_v19  ;;  %1439 = vmatpush.msrb.mxu3 %v1074_v6  ;;  %v1110_v29 = vld [vmem:[#allocation11 + $0x490] sm:$0xff]  ;;  %v1207_v13 = vld [vmem:[#allocation11 + $0x798] sm:$0xff] }
 0x191   : > { %1465 = vmatpush.msra.mxu0 %v1126_v20  ;;  %1488 = vmatpush.msra.mxu1 %v1190_v21  ;;  %v1174_v30 = vld [vmem:[#allocation11 + $0x690] sm:$0xff]  ;;  %v1023_v60 = vld [vmem:[#allocation11 + $0x1d8] sm:$0xff] }
 0x192   : > { %1382 = vmatmul.f32.vlgmr.msrb.gmra.mxu0 %v3184_v38  ;;  %1405 = vmatmul.f32.vlgmr.msrb.gmra.mxu1 %v3186_v39  ;;  %v990_v36 = vld [vmem:[#allocation11 + $0xd0] sm:$0xff]  ;;  %v1087_v61 = vld [vmem:[#allocation11 + $0x3d8] sm:$0xff] }
 0x193   : > { %1417 = vmatpush.msrb.mxu2 %v1006_v22  ;;  %1440 = vmatpush.msrb.mxu3 %v1070_v23  ;;  %v1054_v37 = vld [vmem:[#allocation11 + $0x2d0] sm:$0xff]  ;;  %v1139_v14 = vld [vmem:[#allocation11 + $0x578] sm:$0xff] }
 0x194   : > { %1466 = vmatpush.msra.mxu0 %v1122_v16  ;;  %1489 = vmatpush.msra.mxu1 %v1186_v17  ;;  %v1106_v40 = vld [vmem:[#allocation11 + $0x470] sm:$0xff]  ;;  %v1203_v15 = vld [vmem:[#allocation11 + $0x778] sm:$0xff] }
 0x195   : > { %1418 = vmatpush.msrb.mxu2 %v1002_v24  ;;  %1441 = vmatpush.msrb.mxu3 %v1066_v25  ;;  %v1170_v41 = vld [vmem:[#allocation11 + $0x670] sm:$0xff]  ;;  %v1019_v19 = vld [vmem:[#allocation11 + $0x1b8] sm:$0xff] }
 0x196   : > { %1467 = vmatpush.msra.mxu0 %v1118_v26  ;;  %1490 = vmatpush.msra.mxu1 %v1182_v27  ;;  %v986_v42 = vld [vmem:[#allocation11 + $0xb0] sm:$0xff]  ;;  %v1083_v6 = vld [vmem:[#allocation11 + $0x3b8] sm:$0xff] }
 0x197   : > { %1419 = vmatpush.msrb.mxu2 %v998_v28  ;;  %1442 = vmatpush.msrb.mxu3 %v1062_v31  ;;  %v1050_v43 = vld [vmem:[#allocation11 + $0x2b0] sm:$0xff]  ;;  %v1135_v20 = vld [vmem:[#allocation11 + $0x558] sm:$0xff] }
 0x198   : > { %1468 = vmatpush.msra.mxu0 %v1114_v32  ;;  %1491 = vmatpush.msra.mxu1 %v1178_v33  ;;  %v1102_v44 = vld [vmem:[#allocation11 + $0x450] sm:$0xff]  ;;  %v1199_v21 = vld [vmem:[#allocation11 + $0x758] sm:$0xff] }
 0x199   : > { %1336 = vmatmul.f32.vlgmr.msra.gmra.mxu2 %v3191_v51  ;;  %1359 = vmatmul.f32.vlgmr.msra.gmra.mxu3 %v3195_v55  ;;  %v1166_v45 = vld [vmem:[#allocation11 + $0x650] sm:$0xff]  ;;  %v1015_v22 = vld [vmem:[#allocation11 + $0x198] sm:$0xff] }
 0x19a   : > { %1420 = vmatpush.msrb.mxu2 %v994_v34  ;;  %1443 = vmatpush.msrb.mxu3 %v1058_v35  ;;  %v982_v46 = vld [vmem:[#allocation11 + $0x90] sm:$0xff]  ;;  %v1079_v23 = vld [vmem:[#allocation11 + $0x398] sm:$0xff] }
 0x19b   : > { %1469 = vmatpush.msra.mxu0 %v1110_v29  ;;  %1492 = vmatpush.msra.mxu1 %v1174_v30  ;;  %v1046_v47 = vld [vmem:[#allocation11 + $0x290] sm:$0xff]  ;;  %v1131_v16 = vld [vmem:[#allocation11 + $0x538] sm:$0xff] }
 0x19c   : > { %1385 = vmatmul.f32.gmra.mxu0 %v3201_v62  ;;  %1408 = vmatmul.f32.gmra.mxu1 %v3204_v1  ;;  %v1098_v48 = vld [vmem:[#allocation11 + $0x430] sm:$0xff]  ;;  %v1195_v17 = vld [vmem:[#allocation11 + $0x738] sm:$0xff] }
 0x19d   : > { %1421 = vmatpush.msrb.mxu2 %v990_v36  ;;  %1444 = vmatpush.msrb.mxu3 %v1054_v37  ;;  %v1162_v49 = vld [vmem:[#allocation11 + $0x630] sm:$0xff]  ;;  %v1011_v24 = vld [vmem:[#allocation11 + $0x178] sm:$0xff] }
 0x19e   : > { %1470 = vmatpush.msra.mxu0 %v1106_v40  ;;  %1493 = vmatpush.msra.mxu1 %v1170_v41  ;;  %v978_v50 = vld [vmem:[#allocation11 + $0x70] sm:$0xff]  ;;  %v1075_v25 = vld [vmem:[#allocation11 + $0x378] sm:$0xff] }
 0x19f   : > { %1422 = vmatpush.msrb.mxu2 %v986_v42  ;;  %1445 = vmatpush.msrb.mxu3 %v1050_v43  ;;  %v1042_v52 = vld [vmem:[#allocation11 + $0x270] sm:$0xff]  ;;  %v1127_v26 = vld [vmem:[#allocation11 + $0x518] sm:$0xff] }
 0x1a0   : > { %1471 = vmatpush.msra.mxu0 %v1102_v44  ;;  %1494 = vmatpush.msra.mxu1 %v1166_v45  ;;  %v1094_v53 = vld [vmem:[#allocation11 + $0x410] sm:$0xff]  ;;  %v1191_v27 = vld [vmem:[#allocation11 + $0x718] sm:$0xff] }
 0x1a1   : > { %1423 = vmatpush.msrb.mxu2 %v982_v46  ;;  %1446 = vmatpush.msrb.mxu3 %v1046_v47  ;;  %v1158_v54 = vld [vmem:[#allocation11 + $0x610] sm:$0xff]  ;;  %v1007_v28 = vld [vmem:[#allocation11 + $0x158] sm:$0xff] }
 0x1a2   : > { %1472 = vmatpush.msra.mxu0 %v1098_v48  ;;  %1495 = vmatpush.msra.mxu1 %v1162_v49  ;;  %v974_v58 = vld [vmem:[#allocation11 + $0x50] sm:$0xff]  ;;  %v1071_v31 = vld [vmem:[#allocation11 + $0x358] sm:$0xff] }
 0x1a3   : > { %1339 = vmatmul.f32.gmra.mxu2 %v3211_v18  ;;  %1362 = vmatmul.f32.gmra.mxu3 %v3214_v5  ;;  %v1038_v59 = vld [vmem:[#allocation11 + $0x250] sm:$0xff]  ;;  %v1123_v32 = vld [vmem:[#allocation11 + $0x4f8] sm:$0xff] }
 0x1a4   : > { %1424 = vmatpush.msrb.mxu2 %v978_v50  ;;  %1447 = vmatpush.msrb.mxu3 %v1042_v52  ;;  %v970_v0 = vld [vmem:[#allocation11 + $0x30] sm:$0xff]  ;;  %v1187_v33 = vld [vmem:[#allocation11 + $0x6f8] sm:$0xff] }
 0x1a5   : > { %1473 = vmatpush.msra.mxu0 %v1094_v53  ;;  %1496 = vmatpush.msra.mxu1 %v1158_v54  ;;  %v1034_v3 = vld [vmem:[#allocation11 + $0x230] sm:$0xff]  ;;  %v1003_v34 = vld [vmem:[#allocation11 + $0x138] sm:$0xff] }
 0x1a6   : > { %1425 = vmatpush.msrb.mxu2 %v974_v58  ;;  %1448 = vmatpush.msrb.mxu3 %v1038_v59  ;;  %v966_v8 = vld [vmem:[#allocation11 + $0x10] sm:$0xff]  ;;  %v1067_v35 = vld [vmem:[#allocation11 + $0x338] sm:$0xff] }
 0x1a7   : > { %1550 = vmatpush.msrb.mxu0 %v1155_v56  ;;  %1573 = vmatpush.msrb.mxu1 %v1219_v57  ;;  %v1030_v9 = vld [vmem:[#allocation11 + $0x210] sm:$0xff]  ;;  %v1119_v29 = vld [vmem:[#allocation11 + $0x4d8] sm:$0xff] }
 0x1a8   : > { %1474 = vmatmul.f32.vlgmr.msra.gmra.mxu0 %v3184_v38  ;;  %1497 = vmatmul.f32.vlgmr.msra.gmra.mxu1 %v3186_v39  ;;  %v1183_v30 = vld [vmem:[#allocation11 + $0x6d8] sm:$0xff] }
 0x1a9   : > { %1551 = vmatpush.msrb.mxu0 %v1151_v63  ;;  %1574 = vmatpush.msrb.mxu1 %v1215_v2  ;;  %v999_v36 = vld [vmem:[#allocation11 + $0x118] sm:$0xff] }
 0x1aa   : > { %1426 = vmatpush.msrb.mxu2 %v970_v0  ;;  %1449 = vmatpush.msrb.mxu3 %v1034_v3  ;;  %v1063_v37 = vld [vmem:[#allocation11 + $0x318] sm:$0xff] }
 0x1ab   : > { %1552 = vmatpush.msrb.mxu0 %v1147_v4  ;;  %1575 = vmatpush.msrb.mxu1 %v1211_v7  ;;  %v1115_v40 = vld [vmem:[#allocation11 + $0x4b8] sm:$0xff] }
 0x1ac   : > { %1427 = vmatpush.msrb.mxu2 %v966_v8  ;;  %1450 = vmatpush.msrb.mxu3 %v1030_v9  ;;  %v1179_v41 = vld [vmem:[#allocation11 + $0x6b8] sm:$0xff] }
 0x1ad   : > { %1553 = vmatpush.msrb.mxu0 %v1143_v12  ;;  %1576 = vmatpush.msrb.mxu1 %v1207_v13  ;;  %v995_v42 = vld [vmem:[#allocation11 + $0xf8] sm:$0xff] }
 0x1ae   : > { %1504 = vmatpush.msra.mxu2 %v1027_v10  ;;  %1527 = vmatpush.msra.mxu3 %v1091_v11  ;;  %v1059_v43 = vld [vmem:[#allocation11 + $0x2f8] sm:$0xff] }
 0x1af   : > { %1428 = vmatmul.f32.vlgmr.msrb.gmra.mxu2 %v3191_v51  ;;  %1451 = vmatmul.f32.vlgmr.msrb.gmra.mxu3 %v3195_v55  ;;  %v1111_v44 = vld [vmem:[#allocation11 + $0x498] sm:$0xff] }
 0x1b0   : > { %1505 = vmatpush.msra.mxu2 %v1023_v60  ;;  %1528 = vmatpush.msra.mxu3 %v1087_v61  ;;  %v1175_v45 = vld [vmem:[#allocation11 + $0x698] sm:$0xff]  ;;  %v1658_v60 = vld [vmem:[#allocation13 + $0x70] sm:$0xff]  ;;  %v1673_v61 = vld [vmem:[#allocation13 + $0xe8] sm:$0xff] }
 0x1b1   : > { %1554 = vmatpush.msrb.mxu0 %v1139_v14  ;;  %1577 = vmatpush.msrb.mxu1 %v1203_v15  ;;  %v991_v46 = vld [vmem:[#allocation11 + $0xd8] sm:$0xff]  ;;  %v1656_v14 = vld [vmem:[#allocation13 + $0x60] sm:$0xff] }
 0x1b2   : > { %1477 = vmatmul.f32.gmra.mxu0 %v3201_v62  ;;  %1500 = vmatmul.f32.gmra.mxu1 %v3204_v1  ;;  %v1055_v47 = vld [vmem:[#allocation11 + $0x2d8] sm:$0xff]  ;;  %v1672_v15 = vld [vmem:[#allocation13 + $0xe0] sm:$0xff] }
 0x1b3   : > { %1506 = vmatpush.msra.mxu2 %v1019_v19  ;;  %1529 = vmatpush.msra.mxu3 %v1083_v6  ;;  %v1107_v48 = vld [vmem:[#allocation11 + $0x478] sm:$0xff]  ;;  %v1669_v6 = vld [vmem:[#allocation13 + $0xc8] sm:$0xff] }
 0x1b4   : > { %1555 = vmatpush.msrb.mxu0 %v1135_v20  ;;  %1578 = vmatpush.msrb.mxu1 %v1199_v21  ;;  %v1171_v49 = vld [vmem:[#allocation11 + $0x678] sm:$0xff]  ;;  %v1652_v20 = vld [vmem:[#allocation13 + $0x40] sm:$0xff] }
 0x1b5   : > { %1507 = vmatpush.msra.mxu2 %v1015_v22  ;;  %1530 = vmatpush.msra.mxu3 %v1079_v23  ;;  %v987_v50 = vld [vmem:[#allocation11 + $0xb8] sm:$0xff]  ;;  %v1668_v21 = vld [vmem:[#allocation13 + $0xc0] sm:$0xff] }
 0x1b6   : > { %1556 = vmatpush.msrb.mxu0 %v1131_v16  ;;  %1579 = vmatpush.msrb.mxu1 %v1195_v17  ;;  %v1051_v52 = vld [vmem:[#allocation11 + $0x2b8] sm:$0xff]  ;;  %v1690_v17 = vld [vmem:[#allocation13 + $0x170] sm:$0xff] }
 0x1b7   : > { %1508 = vmatpush.msra.mxu2 %v1011_v24  ;;  %1531 = vmatpush.msra.mxu3 %v1075_v25  ;;  %v1103_v53 = vld [vmem:[#allocation11 + $0x458] sm:$0xff]  ;;  %v1649_v24 = vld [vmem:[#allocation13 + $0x28] sm:$0xff] }
 0x1b8   : > { %1557 = vmatpush.msrb.mxu0 %v1127_v26  ;;  %1580 = vmatpush.msrb.mxu1 %v1191_v27  ;;  %v1167_v54 = vld [vmem:[#allocation11 + $0x658] sm:$0xff]  ;;  %v1665_v25 = vld [vmem:[#allocation13 + $0xa8] sm:$0xff]  ;;  %v1648_v27 = vld [vmem:[#allocation13 + $0x20] sm:$0xff] }
 0x1b9   : > { %1431 = vmatmul.f32.gmra.mxu2 %v3211_v18  ;;  %1454 = vmatmul.f32.gmra.mxu3 %v3214_v5  ;;  %v983_v56 = vld [vmem:[#allocation11 + $0x98] sm:$0xff]  ;;  %v1689_v26 = vld [vmem:[#allocation13 + $0x168] sm:$0xff] }
 0x1ba   : > { %1509 = vmatpush.msra.mxu2 %v1007_v28  ;;  %1532 = vmatpush.msra.mxu3 %v1071_v31  ;;  %v1047_v57 = vld [vmem:[#allocation11 + $0x298] sm:$0xff]  ;;  %v1664_v28 = vld [vmem:[#allocation13 + $0xa0] sm:$0xff] }
 0x1bb   : > { %1558 = vmatpush.msrb.mxu0 %v1123_v32  ;;  %1581 = vmatpush.msrb.mxu1 %v1187_v33  ;;  %v1099_v58 = vld [vmem:[#allocation11 + $0x438] sm:$0xff]  ;;  %v1688_v31 = vld [vmem:[#allocation13 + $0x160] sm:$0xff] }
 0x1bc   : > { %1510 = vmatpush.msra.mxu2 %v1003_v34  ;;  %1533 = vmatpush.msra.mxu3 %v1067_v35  ;;  %v1163_v59 = vld [vmem:[#allocation11 + $0x638] sm:$0xff]  ;;  %v1646_v35 = vld [vmem:[#allocation13 + $0x10] sm:$0xff] }
 0x1bd   : > { %1559 = vmatpush.msrb.mxu0 %v1119_v29  ;;  %1582 = vmatpush.msrb.mxu1 %v1183_v30  ;;  %v979_v63 = vld [vmem:[#allocation11 + $0x78] sm:$0xff]  ;;  %v1662_v29 = vld [vmem:[#allocation13 + $0x90] sm:$0xff] }
 0x1be   : > { %1511 = vmatpush.msra.mxu2 %v999_v36  ;;  %1534 = vmatpush.msra.mxu3 %v1063_v37  ;;  %v1043_v2 = vld [vmem:[#allocation11 + $0x278] sm:$0xff]  ;;  %v1686_v30 = vld [vmem:[#allocation13 + $0x150] sm:$0xff]  ;;  %v1645_v36 = vld [vmem:[#allocation13 + $0x8] sm:$0xff] }
 0x1bf   : > { %1560 = vmatpush.msrb.mxu0 %v1115_v40  ;;  %1583 = vmatpush.msrb.mxu1 %v1179_v41  ;;  %v1095_v0 = vld [vmem:[#allocation11 + $0x418] sm:$0xff]  ;;  %v1661_v37 = vld [vmem:[#allocation13 + $0x88] sm:$0xff]  ;;  %v1644_v41 = vld [vmem:[#allocation13] sm:$0xff] }
 0x1c0   : > { %1512 = vmatpush.msra.mxu2 %v995_v42  ;;  %1535 = vmatpush.msra.mxu3 %v1059_v43  ;;  %v1159_v3 = vld [vmem:[#allocation11 + $0x618] sm:$0xff]  ;;  %v1685_v40 = vld [vmem:[#allocation13 + $0x148] sm:$0xff]  ;;  %v1660_v42 = vld [vmem:[#allocation13 + $0x80] sm:$0xff] }
 0x1c1   : > { %1561 = vmatpush.msrb.mxu0 %v1111_v44  ;;  %1584 = vmatpush.msrb.mxu1 %v1175_v45  ;;  %v975_v4 = vld [vmem:[#allocation11 + $0x58] sm:$0xff]  ;;  %v1684_v43 = vld [vmem:[#allocation13 + $0x140] sm:$0xff] }
 0x1c2   : > { %1513 = vmatpush.msra.mxu2 %v991_v46  ;;  %1536 = vmatpush.msra.mxu3 %v1055_v47  ;;  %v1039_v7 = vld [vmem:[#allocation11 + $0x258] sm:$0xff]  ;;  %v1880_v47 = vld [vmem:[#allocation13 + $0x470] sm:$0xff] }
 0x1c3   : > { %1562 = vmatpush.msrb.mxu0 %v1107_v48  ;;  %1585 = vmatpush.msrb.mxu1 %v1171_v49  ;;  %v971_v8 = vld [vmem:[#allocation11 + $0x38] sm:$0xff]  ;;  %v1896_v48 = vld [vmem:[#allocation13 + $0x4f0] sm:$0xff] }
 0x1c4   : > { %1514 = vmatpush.msra.mxu2 %v987_v50  ;;  %1537 = vmatpush.msra.mxu3 %v1051_v52  ;;  %v1035_v9 = vld [vmem:[#allocation11 + $0x238] sm:$0xff]  ;;  %v1682_v49 = vld [vmem:[#allocation13 + $0x130] sm:$0xff]  ;;  %v1879_v50 = vld [vmem:[#allocation13 + $0x468] sm:$0xff] }
 0x1c5   : > { %1563 = vmatpush.msrb.mxu0 %v1103_v53  ;;  %1586 = vmatpush.msrb.mxu1 %v1167_v54  ;;  %v967_v10 = vld [vmem:[#allocation11 + $0x18] sm:$0xff]  ;;  %v1895_v52 = vld [vmem:[#allocation13 + $0x4e8] sm:$0xff]  ;;  %v1878_v54 = vld [vmem:[#allocation13 + $0x460] sm:$0xff] }
 0x1c6   : > { %1515 = vmatpush.msra.mxu2 %v983_v56  ;;  %1538 = vmatpush.msra.mxu3 %v1047_v57  ;;  %v1031_v11 = vld [vmem:[#allocation11 + $0x218] sm:$0xff]  ;;  %v1681_v53 = vld [vmem:[#allocation13 + $0x128] sm:$0xff]  ;;  %v1894_v56 = vld [vmem:[#allocation13 + $0x4e0] sm:$0xff] }
 0x1c7   : > { %1564 = vmatpush.msrb.mxu0 %v1099_v58  ;;  %1587 = vmatpush.msrb.mxu1 %v1163_v59  ;;  %v1659_v12 = vld [vmem:[#allocation13 + $0x78] sm:$0xff]  ;;  %v1220_v57 = vld [vmem:[%s3083_s26] sm:$0xff] }
 0x1c8   : > { %1516 = vmatpush.msra.mxu2 %v979_v63  ;;  %1539 = vmatpush.msra.mxu3 %v1043_v2  ;;  %v1675_v13 = vld [vmem:[#allocation13 + $0xf8] sm:$0xff]  ;;  %v1680_v58 = vld [vmem:[#allocation13 + $0x120] sm:$0xff] }
 0x1c9   : > { %1565 = vmatpush.msrb.mxu0 %v1095_v0  ;;  %1588 = vmatpush.msrb.mxu1 %v1159_v3  ;;  %v1655_v19 = vld [vmem:[#allocation13 + $0x58] sm:$0xff]  ;;  %v1876_v3 = vld [vmem:[#allocation13 + $0x450] sm:$0xff] }
 0x1ca   : > { %1566 = vmatmul.f32.vlgmr.msrb.gmra.mxu0 %v3184_v38  ;;  %1589 = vmatmul.f32.vlgmr.msrb.gmra.mxu1 %v3186_v39  ;;  %v1674_v38 = vld [vmem:[#allocation13 + $0xf0] sm:$0xff]  ;;  %v1657_v39 = vld [vmem:[#allocation13 + $0x68] sm:$0xff]  ;;  %v1651_v22 = vld [vmem:[#allocation13 + $0x38] sm:$0xff] }
 0x1cb   : > { %1517 = vmatpush.msra.mxu2 %v975_v4  ;;  %1540 = vmatpush.msra.mxu3 %v1039_v7  ;;  %v1691_v23 = vld [vmem:[#allocation13 + $0x178] sm:$0xff]  ;;  %v1892_v4 = vld [vmem:[#allocation13 + $0x4d0] sm:$0xff] }
 0x1cc   : > { %v1667_v16 = vld [vmem:[#allocation13 + $0xb8] sm:$0xff]  ;;  %1754 = vmatpush.msra.mxu0 %v1691_v23  ;;  %v1912_v23 = vld [vmem:[#allocation13 + $0x570] sm:$0xff] }
 0x1cd   : > { %1518 = vmatpush.msra.mxu2 %v971_v8  ;;  %1541 = vmatpush.msra.mxu3 %v1035_v9  ;;  %v1647_v32 = vld [vmem:[#allocation13 + $0x18] sm:$0xff]  ;;  %v1678_v8 = vld [vmem:[#allocation13 + $0x110] sm:$0xff]  ;;  %v1875_v9 = vld [vmem:[#allocation13 + $0x448] sm:$0xff] }
 0x1ce   : > { %1755 = vmatpush.msra.mxu0 %v1690_v17  ;;  %v1663_v33 = vld [vmem:[#allocation13 + $0x98] sm:$0xff]  ;;  %v1887_v17 = vld [vmem:[#allocation13 + $0x4a8] sm:$0xff] }
 0x1cf   : > { %1519 = vmatpush.msra.mxu2 %v967_v10  ;;  %1542 = vmatpush.msra.mxu3 %v1031_v11  ;;  %v1687_v34 = vld [vmem:[#allocation13 + $0x158] sm:$0xff]  ;;  %v1891_v10 = vld [vmem:[#allocation13 + $0x4c8] sm:$0xff] }
 0x1d0   : > { %1520 = vmatmul.f32.vlgmr.msra.gmra.mxu2 %v3191_v51  ;;  %1543 = vmatmul.f32.vlgmr.msra.gmra.mxu3 %v3195_v55  ;;  %v1671_v51 = vld [vmem:[#allocation13 + $0xd8] sm:$0xff]  ;;  %v1654_v55 = vld [vmem:[#allocation13 + $0x50] sm:$0xff] }
 0x1d1   : > { %1708 = vmatpush.msrb.mxu2 %v1659_v12  ;;  %1731 = vmatpush.msrb.mxu3 %v1675_v13  ;;  %v1881_v44 = vld [vmem:[#allocation13 + $0x478] sm:$0xff]  ;;  %v1677_v12 = vld [vmem:[#allocation13 + $0x108] sm:$0xff]  ;;  %v1874_v13 = vld [vmem:[#allocation13 + $0x440] sm:$0xff] }
 0x1d2   : > { %1569 = vmatmul.f32.gmra.mxu0 %v3201_v62  ;;  %1592 = vmatmul.f32.gmra.mxu1 %v3204_v1  ;;  %v1670_v62 = vld [vmem:[#allocation13 + $0xd0] sm:$0xff]  ;;  %v1653_v1 = vld [vmem:[#allocation13 + $0x48] sm:$0xff]  ;;  %v1897_v45 = vld [vmem:[#allocation13 + $0x4f8] sm:$0xff] }
 0x1d3   : > { %1709 = vmatpush.msrb.mxu2 %v1658_v60  ;;  %1732 = vmatpush.msrb.mxu3 %v1674_v38  ;;  %v1683_v46 = vld [vmem:[#allocation13 + $0x138] sm:$0xff]  ;;  %v1890_v38 = vld [vmem:[#allocation13 + $0x4c0] sm:$0xff] }
 0x1d4   : > { %1756 = vmatpush.msra.mxu0 %v1689_v26  ;;  %v1877_v59 = vld [vmem:[#allocation13 + $0x458] sm:$0xff] }
 0x1d5   : > { %1710 = vmatpush.msrb.mxu2 %v1657_v39  ;;  %1733 = vmatpush.msrb.mxu3 %v1673_v61  ;;  %v1893_v63 = vld [vmem:[#allocation13 + $0x4d8] sm:$0xff] }
 0x1d6   : > { %1757 = vmatpush.msra.mxu0 %v1688_v31  ;;  %v1679_v0 = vld [vmem:[#allocation13 + $0x118] sm:$0xff]  ;;  %v1886_v31 = vld [vmem:[#allocation13 + $0x4a0] sm:$0xff] }
 0x1d7   : > { %1711 = vmatpush.msrb.mxu2 %v1656_v14  ;;  %1734 = vmatpush.msrb.mxu3 %v1672_v15  ;;  %v1676_v15 = vld [vmem:[#allocation13 + $0x100] sm:$0xff] }
 0x1d8   : > { %1523 = vmatmul.f32.gmra.mxu2 %v3211_v18  ;;  %1546 = vmatmul.f32.gmra.mxu3 %v3214_v5  ;;  %v1650_v18 = vld [vmem:[#allocation13 + $0x30] sm:$0xff] }
 0x1d9   : > { %1712 = vmatpush.msrb.mxu2 %v1655_v19  ;;  %1735 = vmatpush.msrb.mxu3 %v1671_v51  ;;  %v1666_v5 = vld [vmem:[#allocation13 + $0xb0] sm:$0xff]  ;;  %v1707_v19 = vld [vmem:[#allocation13 + $0x1f8] sm:$0xff] }
 0x1da   : > { %1758 = vmatpush.msra.mxu0 %v1687_v34  ;;  %v1873_v51 = vld [vmem:[#allocation13 + $0x438] sm:$0xff]  ;;  %1777 = vmatpush.msra.mxu1 %v1707_v19  ;;  %v1696_v19 = vld [vmem:[#allocation13 + $0x1a0] sm:$0xff] }
 0x1db   : > { %1713 = vmatpush.msrb.mxu2 %v1654_v55  ;;  %1736 = vmatpush.msrb.mxu3 %v1670_v62  ;;  %v1224_v62 = vld [vmem:[%s3083_s26 + $0x20] sm:$0xff] }
 0x1dc   : > { %1759 = vmatpush.msra.mxu0 %v1686_v30  ;;  %v1869_v30 = vld [vmem:[#allocation13 + $0x418] sm:$0xff] }
 0x1dd   : > { %1714 = vmatpush.msrb.mxu2 %v1653_v1  ;;  %1737 = vmatpush.msrb.mxu3 %v1669_v6  ;;  %v1889_v1 = vld [vmem:[#allocation13 + $0x4b8] sm:$0xff] }
 0x1de   : > { %1760 = vmatpush.msra.mxu0 %v1685_v40  ;;  %v1913_v6 = vld [vmem:[#allocation13 + $0x578] sm:$0xff] }
 0x1df   : > { %1715 = vmatpush.msrb.mxu2 %v1652_v20  ;;  %1738 = vmatpush.msrb.mxu3 %v1668_v21  ;;  %v1706_v20 = vld [vmem:[#allocation13 + $0x1f0] sm:$0xff]  ;;  %v1909_v40 = vld [vmem:[#allocation13 + $0x558] sm:$0xff] }
 0x1e0   : > { %1761 = vmatpush.msra.mxu0 %v1684_v43  ;;  %v1872_v21 = vld [vmem:[#allocation13 + $0x430] sm:$0xff]  ;;  %1778 = vmatpush.msra.mxu1 %v1706_v20  ;;  %v1901_v20 = vld [vmem:[#allocation13 + $0x518] sm:$0xff] }
 0x1e1   : > { %1716 = vmatpush.msrb.mxu2 %v1651_v22  ;;  %1739 = vmatpush.msrb.mxu3 %v1667_v16  ;;  %v1888_v22 = vld [vmem:[#allocation13 + $0x4b0] sm:$0xff] }
 0x1e2   : > { %1762 = vmatpush.msra.mxu0 %v1683_v46  ;;  %v1868_v43 = vld [vmem:[#allocation13 + $0x410] sm:$0xff] }
 0x1e3   : > { %1717 = vmatpush.msrb.mxu2 %v1650_v18  ;;  %1740 = vmatpush.msrb.mxu3 %v1666_v5  ;;  %v1705_v18 = vld [vmem:[#allocation13 + $0x1e8] sm:$0xff]  ;;  %v1908_v46 = vld [vmem:[#allocation13 + $0x550] sm:$0xff] }
 0x1e4   : > { %1763 = vmatpush.msra.mxu0 %v1682_v49  ;;  %v1871_v5 = vld [vmem:[#allocation13 + $0x428] sm:$0xff]  ;;  %1779 = vmatpush.msra.mxu1 %v1705_v18  ;;  %v1694_v18 = vld [vmem:[#allocation13 + $0x190] sm:$0xff] }
 0x1e5   : > { %1718 = vmatpush.msrb.mxu2 %v1649_v24  ;;  %1741 = vmatpush.msrb.mxu3 %v1665_v25  ;;  %v1911_v24 = vld [vmem:[#allocation13 + $0x568] sm:$0xff]  ;;  %v1704_v25 = vld [vmem:[#allocation13 + $0x1e0] sm:$0xff] }
 0x1e6   : > { %1764 = vmatpush.msra.mxu0 %v1681_v53  ;;  %1780 = vmatpush.msra.mxu1 %v1704_v25  ;;  %v1867_v49 = vld [vmem:[#allocation13 + $0x408] sm:$0xff] }
 0x1e7   : > { %1719 = vmatpush.msrb.mxu2 %v1648_v27  ;;  %1742 = vmatpush.msrb.mxu3 %v1664_v28  ;;  %v1870_v28 = vld [vmem:[#allocation13 + $0x420] sm:$0xff]  ;;  %v1883_v53 = vld [vmem:[#allocation13 + $0x488] sm:$0xff] }
 0x1e8   : > { %1765 = vmatpush.msra.mxu0 %v1680_v58  ;;  %v1700_v58 = vld [vmem:[#allocation13 + $0x1c0] sm:$0xff]  ;;  %v1693_v25 = vld [vmem:[#allocation13 + $0x188] sm:$0xff] }
 0x1e9   : > { %1720 = vmatpush.msrb.mxu2 %v1647_v32  ;;  %1743 = vmatpush.msrb.mxu3 %v1663_v33  ;;  %v1910_v33 = vld [vmem:[#allocation13 + $0x560] sm:$0xff] }
 0x1ea   : > { %1766 = vmatpush.msra.mxu0 %v1679_v0  ;;  %v1906_v0 = vld [vmem:[#allocation13 + $0x540] sm:$0xff] }
 0x1eb   : > { %1721 = vmatpush.msrb.mxu2 %v1646_v35  ;;  %1744 = vmatpush.msrb.mxu3 %v1662_v29  ;;  %v1703_v29 = vld [vmem:[#allocation13 + $0x1d8] sm:$0xff] }
 0x1ec   : > { %1767 = vmatpush.msra.mxu0 %v1678_v8  ;;  %1781 = vmatpush.msra.mxu1 %v1703_v29  ;;  %v1699_v8 = vld [vmem:[#allocation13 + $0x1b8] sm:$0xff] }
 0x1ed   : > { %1722 = vmatpush.msrb.mxu2 %v1645_v36  ;;  %1745 = vmatpush.msrb.mxu3 %v1661_v37  ;;  %v1885_v37 = vld [vmem:[#allocation13 + $0x498] sm:$0xff] }
 0x1ee   : > { %1768 = vmatpush.msra.mxu0 %v1677_v12  ;;  %v1698_v12 = vld [vmem:[#allocation13 + $0x1b0] sm:$0xff] }
 0x1ef   : > { %1723 = vmatpush.msrb.mxu2 %v1644_v41  ;;  %1746 = vmatpush.msrb.mxu3 %v1660_v42  ;;  %v1702_v42 = vld [vmem:[#allocation13 + $0x1d0] sm:$0xff] }
 0x1f0   : > { %1769 = vmatpush.msra.mxu0 %v1676_v15  ;;  %1782 = vmatpush.msra.mxu1 %v1702_v42  ;;  %v1927_v42 = vld [vmem:[#allocation13 + $0x5e8] sm:$0xff] }
 0x1f1   : > { %1930 = vmatpush.msra.mxu2 %v1881_v44  ;;  %1953 = vmatpush.msra.mxu3 %v1897_v45  ;;  %v1884_v45 = vld [vmem:[#allocation13 + $0x490] sm:$0xff] }
 0x1f2   : > { %1976 = vmatpush.msrb.mxu0 %v1913_v6 }
 0x1f3   : > { %1931 = vmatpush.msra.mxu2 %v1880_v47  ;;  %1954 = vmatpush.msra.mxu3 %v1896_v48  ;;  %v1701_v48 = vld [vmem:[#allocation13 + $0x1c8] sm:$0xff] }
 0x1f4   : > { %1977 = vmatpush.msrb.mxu0 %v1912_v23  ;;  %1783 = vmatpush.msra.mxu1 %v1701_v48 }
 0x1f5   : > { %1932 = vmatpush.msra.mxu2 %v1879_v50  ;;  %1955 = vmatpush.msra.mxu3 %v1895_v52  ;;  %v1221_v52 = vld [vmem:[%s3083_s26 + $0x8] sm:$0xff] }
 0x1f6   : > { %1978 = vmatpush.msrb.mxu0 %v1911_v24  ;;  %1784 = vmatpush.msra.mxu1 %v1700_v58  ;;  %v1900_v24 = vld [vmem:[#allocation13 + $0x510] sm:$0xff] }
 0x1f7   : > { %1933 = vmatpush.msra.mxu2 %v1878_v54  ;;  %1956 = vmatpush.msra.mxu3 %v1894_v56  ;;  %v1907_v54 = vld [vmem:[#allocation13 + $0x548] sm:$0xff] }
 0x1f8   : > { %1979 = vmatpush.msrb.mxu0 %v1910_v33  ;;  %1785 = vmatpush.msra.mxu1 %v1699_v8  ;;  %v1898_v33 = vld [vmem:[#allocation13 + $0x500] sm:$0xff]  ;;  %v1226_v8 = vld [vmem:[%s3083_s26 + $0x30] sm:$0xff] }
 0x1f9   : > { %1934 = vmatpush.msra.mxu2 %v1877_v59  ;;  %1957 = vmatpush.msra.mxu3 %v1893_v63  ;;  %v1866_v59 = vld [vmem:[#allocation13 + $0x400] sm:$0xff] }
 0x1fa   : > { %1980 = vmatpush.msrb.mxu0 %v1909_v40  ;;  %1786 = vmatpush.msra.mxu1 %v1698_v12  ;;  %v1222_v40 = vld [vmem:[%s3083_s26 + $0x10] sm:$0xff] }
 0x1fb   : > { %1935 = vmatpush.msra.mxu2 %v1876_v3  ;;  %1958 = vmatpush.msra.mxu3 %v1892_v4  ;;  %v1811_v12 = vld [vmem:[#allocation13 + $0x250] sm:$0xff] }
 0x1fc   : > { %v1291_v39 = vpop.f32.mrf.mxu0  ;;  %1981 = vmatpush.msrb.mxu0 %v1908_v46 }
 0x1fd   : > { %1936 = vmatpush.msra.mxu2 %v1875_v9  ;;  %1959 = vmatpush.msra.mxu3 %v1891_v10  ;;  %v1314_v14 = vpop.f32.mrf.mxu1  ;;  %v1905_v10 = vld [vmem:[#allocation13 + $0x538] sm:$0xff] }
 0x1fe   : > { %1982 = vmatpush.msrb.mxu0 %v1907_v54  ;;  %v1814_v54 = vld [vmem:[#allocation13 + $0x268] sm:$0xff] }
 0x1ff   : > { %1937 = vmatpush.msra.mxu2 %v1874_v13  ;;  %1960 = vmatpush.msra.mxu3 %v1890_v38 }
 0x200   : > { %1983 = vmatpush.msrb.mxu0 %v1906_v0 }
 0x201   : > { %1938 = vmatpush.msra.mxu2 %v1873_v51  ;;  %1961 = vmatpush.msra.mxu3 %v1889_v1  ;;  %v1902_v51 = vld [vmem:[#allocation13 + $0x520] sm:$0xff] }
 0x202   : > { %1984 = vmatpush.msrb.mxu0 %v1905_v10  ;;  %v1922_v10 = vld [vmem:[#allocation13 + $0x5c0] sm:$0xff] }
 0x203   : > { %1939 = vmatpush.msra.mxu2 %v1872_v21  ;;  %1962 = vmatpush.msra.mxu3 %v1888_v22 }
 0x205   : > { %1940 = vmatpush.msra.mxu2 %v1871_v5  ;;  %1963 = vmatpush.msra.mxu3 %v1887_v17  ;;  %v1294_v36 = vpop.f32.mrf.mxu0  ;;  %v1317_v44 = vpop.f32.mrf.mxu1 }
 0x207   : > { %v1245_v2 = vpop.f32.mrf.mxu2  ;;  %1941 = vmatpush.msra.mxu2 %v1870_v28  ;;  %1964 = vmatpush.msra.mxu3 %v1886_v31  ;;  %v1692_v31 = vld [vmem:[#allocation13 + $0x180] sm:$0xff] }
 0x208   : > { %v1246_v7 = vadd.f32 %v1245_v2, %v1220_v57  ;;  %v1268_v11 = vpop.f32.mrf.mxu3  ;;  %v1882_v2 = vld [vmem:[#allocation13 + $0x480] sm:$0xff] }
 0x209   : > { %1942 = vmatpush.msra.mxu2 %v1869_v30  ;;  %1965 = vmatpush.msra.mxu3 %v1885_v37  ;;  %v1928_v30 = vld [vmem:[#allocation13 + $0x5f0] sm:$0xff] }
 0x20a   : > { %v1269_v60 = vadd.f32 %v1268_v11, %v1246_v7 }
 0x20b   : > { %1943 = vmatpush.msra.mxu2 %v1868_v43  ;;  %1966 = vmatpush.msra.mxu3 %v1884_v45  ;;  %v1816_v43 = vld [vmem:[#allocation13 + $0x278] sm:$0xff]  ;;  %v1926_v45 = vld [vmem:[#allocation13 + $0x5e0] sm:$0xff] }
 0x20c   : > { %v1292_v61 = vadd.f32 %v1291_v39, %v1269_v60  ;;  %v1904_v60 = vld [vmem:[#allocation13 + $0x530] sm:$0xff]  ;;  %v1697_v39 = vld [vmem:[#allocation13 + $0x1a8] sm:$0xff] }
 0x20d   : > { %1944 = vmatpush.msra.mxu2 %v1867_v49  ;;  %1967 = vmatpush.msra.mxu3 %v1883_v53  ;;  %v1815_v49 = vld [vmem:[#allocation13 + $0x270] sm:$0xff] }
 0x20e   : > { %v3243_v55 = vadd.f32 %v1314_v14, %v1292_v61  ;;  %1985 = vmatpush.msrb.mxu0 %v1904_v60  ;;  %v1903_v14 = vld [vmem:[#allocation13 + $0x528] sm:$0xff]  ;;  %1787 = vmatpush.msra.mxu1 %v1697_v39 }
 0x20f   : > { %1945 = vmatpush.msra.mxu2 %v1866_v59  ;;  %1968 = vmatpush.msra.mxu3 %v1882_v2  ;;  %v1383_v13 = vpop.f32.mrf.mxu0  ;;  %v1406_v61 = vpop.f32.mrf.mxu1  ;;  %v1813_v59 = vld [vmem:[#allocation13 + $0x260] sm:$0xff]  ;;  %v1923_v2 = vld [vmem:[#allocation13 + $0x5c8] sm:$0xff] }
 0x210   : > { %v1604_v16 = vmin.f32 %v3243_v55, 0.0  ;;  %vm1596_vm10 = vcmp.gt.f32.partialorder %v3243_v55, 0.0  ;;  %1986 = vmatpush.msrb.mxu0 %v1903_v14  ;;  %1788 = vmatpush.msra.mxu1 %v1696_v19  ;;  %v1810_v14 = vld [vmem:[#allocation13 + $0x248] sm:$0xff]  ;;  %v1920_v19 = vld [vmem:[#allocation13 + $0x5b0] sm:$0xff] }
 0x212   : > { %v1612_v26 = vmul.f32 1.442695, %v1604_v16  ;;  %v1248_v27 = vpop.f32.mrf.mxu2  ;;  %v1271_v34 = vpop.f32.mrf.mxu3  ;;  %1987 = vmatpush.msrb.mxu0 %v1902_v51 }
 0x213   : > { %v1249_v32 = vadd.f32 %v1248_v27, %v1224_v62  ;;  %v1695_v62 = vld [vmem:[#allocation13 + $0x198] sm:$0xff]  ;;  %v1899_v27 = vld [vmem:[#allocation13 + $0x508] sm:$0xff] }
 0x214   : > { %2533 = vpow2.f32 %v1612_v26  ;;  %1789 = vmatpush.msra.mxu1 %v1695_v62  ;;  %1988 = vmatpush.msrb.mxu0 %v1901_v20  ;;  %v1808_v20 = vld [vmem:[#allocation13 + $0x238] sm:$0xff] }
 0x215   : > { %v1272_v35 = vadd.f32 %v1271_v34, %v1249_v32  ;;  %v1929_v34 = vld [vmem:[#allocation13 + $0x5f8] sm:$0xff] }
 0x216   : > { %1790 = vmatpush.msra.mxu1 %v1694_v18  ;;  %1989 = vmatpush.msrb.mxu0 %v1900_v24  ;;  %v1917_v18 = vld [vmem:[#allocation13 + $0x598] sm:$0xff]  ;;  %v1806_v24 = vld [vmem:[#allocation13 + $0x228] sm:$0xff] }
 0x217   : > { %v1295_v41 = vadd.f32 %v1294_v36, %v1272_v35 }
 0x218   : > { %1791 = vmatpush.msra.mxu1 %v1693_v25  ;;  %1990 = vmatpush.msrb.mxu0 %v1899_v27 }
 0x219   : > { %v3247_v47 = vadd.f32 %v1317_v44, %v1295_v41  ;;  %v1386_v28 = vpop.f32.mrf.mxu0  ;;  %v1409_v35 = vpop.f32.mrf.mxu1 }
 0x21a   : > { %v2534_v50 = vpop.eup %2533  ;;  %1792 = vmatpush.msra.mxu1 %v1692_v31  ;;  %1991 = vmatpush.msrb.mxu0 %v1898_v33  ;;  %v1805_v31 = vld [vmem:[#allocation13 + $0x220] sm:$0xff] }
 0x21b   : > { %v2388_v56 = vadd.f32 -1.0, %v2534_v50  ;;  %v1608_v57 = vmin.f32 %v3247_v47, 0.0  ;;  %vm1600_vm11 = vcmp.gt.f32.partialorder %v3247_v47, 0.0 }
 0x21c   : > { %v1337_v63 = vpop.f32.mrf.mxu2  ;;  %v1360_v9 = vpop.f32.mrf.mxu3  ;;  %1999 = vmatpush.msrb.mxu1 %v1929_v34  ;;  %v1915_v34 = vld [vmem:[#allocation13 + $0x588] sm:$0xff] }
 0x21d   : > { %v1338_v3 = vadd.f32 %v1337_v63, %v1221_v52  ;;  %v3253_v4 = vsel %vm1596_vm10, %v3243_v55, %v2388_v56  ;;  %v1620_v7 = vmul.f32 1.442695, %v1608_v57  ;;  %v1225_v55 = vld [vmem:[%s3083_s26 + $0x28] sm:$0xff]  ;;  %v1925_v52 = vld [vmem:[#allocation13 + $0x5d8] sm:$0xff]  ;;  %v1924_v57 = vld [vmem:[#allocation13 + $0x5d0] sm:$0xff] }
 0x21e   : > { %1724 = vmatmul.f32.vlgmr.msrb.gmra.mxu2 %v3253_v4  ;;  %2000 = vmatpush.msrb.mxu1 %v1928_v30  ;;  %v1914_v30 = vld [vmem:[#allocation13 + $0x580] sm:$0xff] }
 0x21f   : > { %v1361_v11 = vadd.f32 %v1360_v9, %v1338_v3  ;;  %2535 = vpow2.f32 %v1620_v7  ;;  %v1812_v7 = vld [vmem:[#allocation13 + $0x258] sm:$0xff] }
 0x220   : > { %2001 = vmatpush.msrb.mxu1 %v1927_v42 }
 0x221   : > { %v1384_v38 = vadd.f32 %v1383_v13, %v1361_v11 }
 0x222   : > { %2002 = vmatpush.msrb.mxu1 %v1926_v45 }
 0x223   : > { %v1407_v15 = vadd.f32 %v1406_v61, %v1384_v38  ;;  %v1921_v38 = vld [vmem:[#allocation13 + $0x5b8] sm:$0xff] }
 0x224   : > { %2003 = vmatpush.msrb.mxu1 %v1925_v52  ;;  %v1826_v52 = vld [vmem:[#allocation13 + $0x2c8] sm:$0xff] }
 0x225   : > { %v2536_v1 = vpop.eup %2535  ;;  %v1605_v6 = vmin.f32 %v1407_v15, 0.0  ;;  %vm1597_vm12 = vcmp.gt.f32.partialorder %v1407_v15, 0.0  ;;  %v1475_v56 = vpop.f32.mrf.mxu0 }
 0x226   : > { %v1340_v21 = vpop.f32.mrf.mxu2  ;;  %v2392_v22 = vadd.f32 -1.0, %v2536_v1  ;;  %v1363_v5 = vpop.f32.mrf.mxu3  ;;  %2004 = vmatpush.msrb.mxu1 %v1924_v57  ;;  %v1919_v1 = vld [vmem:[#allocation13 + $0x5a8] sm:$0xff]  ;;  %v1825_v57 = vld [vmem:[#allocation13 + $0x2c0] sm:$0xff] }
 0x227   : > { %v1614_v23 = vmul.f32 1.442695, %v1605_v6  ;;  %v1341_v16 = vadd.f32 %v1340_v21, %v1225_v55  ;;  %v1498_v63 = vpop.f32.mrf.mxu1  ;;  %v1809_v55 = vld [vmem:[#allocation13 + $0x240] sm:$0xff] }
 0x228   : > { %v3259_v17 = vsel %vm1600_vm11, %v3247_v47, %v2392_v22  ;;  %2005 = vmatpush.msrb.mxu1 %v1923_v2  ;;  %v1918_v22 = vld [vmem:[#allocation13 + $0x5a0] sm:$0xff] }
 0x229   : > { %v1364_v26 = vadd.f32 %v1363_v5, %v1341_v16  ;;  %1727 = vmatmul.f32.gmra.mxu2 %v3259_v17  ;;  %2537 = vpow2.f32 %v1614_v23  ;;  %v1807_v16 = vld [vmem:[#allocation13 + $0x230] sm:$0xff] }
 0x22a   : > { %2006 = vmatpush.msrb.mxu1 %v1922_v10 }
 0x22b   : > { %v1387_v32 = vadd.f32 %v1386_v28, %v1364_v26  ;;  %v1916_v26 = vld [vmem:[#allocation13 + $0x590] sm:$0xff]  ;;  %v1832_v28 = vld [vmem:[#allocation13 + $0x2f8] sm:$0xff] }
 0x22c   : > { %2007 = vmatpush.msrb.mxu1 %v1921_v38 }
 0x22d   : > { %v1410_v29 = vadd.f32 %v1409_v35, %v1387_v32  ;;  %v1831_v35 = vld [vmem:[#allocation13 + $0x2f0] sm:$0xff] }
 0x22e   : > { %2008 = vmatpush.msrb.mxu1 %v1920_v19  ;;  %v1819_v19 = vld [vmem:[#allocation13 + $0x290] sm:$0xff] }
 0x22f   : > { %v2538_v36 = vpop.eup %2537  ;;  %v1609_v37 = vmin.f32 %v1410_v29, 0.0  ;;  %vm1601_vm13 = vcmp.gt.f32.partialorder %v1410_v29, 0.0  ;;  %v1478_v62 = vpop.f32.mrf.mxu0 }
 0x230   : > { %v2389_v41 = vadd.f32 -1.0, %v2538_v36  ;;  %v1501_v21 = vpop.f32.mrf.mxu1  ;;  %2009 = vmatpush.msrb.mxu1 %v1919_v1  ;;  %v1830_v36 = vld [vmem:[#allocation13 + $0x2e8] sm:$0xff]  ;;  %v1817_v1 = vld [vmem:[#allocation13 + $0x280] sm:$0xff] }
 0x231   : > { %1946 = vmatmul.f32.vlgmr.msra.gmra.mxu2 %v3253_v4  ;;  %v1622_v44 = vmul.f32 1.442695, %v1609_v37  ;;  %v1803_v37 = vld [vmem:[#allocation13 + $0x210] sm:$0xff] }
 0x232   : > { %v1429_v46 = vpop.f32.mrf.mxu2  ;;  %v3264_v47 = vsel %vm1597_vm12, %v1407_v15, %v2389_v41  ;;  %v1452_v50 = vpop.f32.mrf.mxu3  ;;  %2010 = vmatpush.msrb.mxu1 %v1918_v22  ;;  %v1802_v41 = vld [vmem:[#allocation13 + $0x208] sm:$0xff] }
 0x233   : > { %v1430_v48 = vadd.f32 %v1429_v46, %v1222_v40  ;;  %1747 = vmatmul.f32.vlgmr.msrb.gmra.mxu3 %v3264_v47  ;;  %2539 = vpow2.f32 %v1622_v44  ;;  %v1829_v40 = vld [vmem:[#allocation13 + $0x2e0] sm:$0xff]  ;;  %v1223_v46 = vld [vmem:[%s3083_s26 + $0x18] sm:$0xff] }
 0x234   : > { %2045 = vmatpush.msrb.mxu3 %v1816_v43  ;;  %2011 = vmatpush.msrb.mxu1 %v1917_v18  ;;  %v1828_v43 = vld [vmem:[#allocation13 + $0x2d8] sm:$0xff]  ;;  %v1801_v44 = vld [vmem:[#allocation13 + $0x200] sm:$0xff] }
 0x235   : > { %v1453_v53 = vadd.f32 %v1452_v50, %v1430_v48  ;;  %v1827_v48 = vld [vmem:[#allocation13 + $0x2d0] sm:$0xff] }
 0x236   : > { %2046 = vmatpush.msrb.mxu3 %v1815_v49  ;;  %2012 = vmatpush.msrb.mxu1 %v1916_v26 }
 0x237   : > { %v1476_v58 = vadd.f32 %v1475_v56, %v1453_v53 }
 0x238   : > { %2047 = vmatpush.msrb.mxu3 %v1814_v54  ;;  %2013 = vmatpush.msrb.mxu1 %v1915_v34  ;;  %v1838_v34 = vld [vmem:[#allocation13 + $0x328] sm:$0xff] }
 0x239   : > { %v2540_v0 = vpop.eup %2539  ;;  %v1499_v3 = vadd.f32 %v1498_v63, %v1476_v58  ;;  %1949 = vmatmul.f32.gmra.mxu2 %v3259_v17  ;;  %v1824_v63 = vld [vmem:[#allocation13 + $0x2b8] sm:$0xff] }
 0x23a   : > { %2048 = vmatpush.msrb.mxu3 %v1813_v59  ;;  %v2393_v9 = vadd.f32 -1.0, %v2540_v0  ;;  %2014 = vmatpush.msrb.mxu1 %v1914_v30  ;;  %v1227_v0 = vld [vmem:[%s3083_s26 + $0x38] sm:$0xff]  ;;  %v1835_v30 = vld [vmem:[#allocation13 + $0x310] sm:$0xff] }
 0x23b   : > { %v1606_v11 = vmin.f32 %v1499_v3, 0.0  ;;  %vm1598_vm14 = vcmp.gt.f32.partialorder %v1499_v3, 0.0 }
 0x23c   : > { %v1432_v13 = vpop.f32.mrf.mxu2  ;;  %v3269_v60 = vsel %vm1601_vm13, %v1410_v29, %v2393_v9  ;;  %2049 = vmatpush.msrb.mxu3 %v1812_v7  ;;  %v1455_v15 = vpop.f32.mrf.mxu3  ;;  %v1804_v29 = vld [vmem:[#allocation13 + $0x218] sm:$0xff]  ;;  %v1822_v9 = vld [vmem:[#allocation13 + $0x2a8] sm:$0xff] }
 0x23d   : > { %v1616_v39 = vmul.f32 1.442695, %v1606_v11  ;;  %v1433_v61 = vadd.f32 %v1432_v13, %v1226_v8  ;;  %1750 = vmatmul.f32.gmra.mxu3 %v3269_v60  ;;  %v1821_v13 = vld [vmem:[#allocation13 + $0x2a0] sm:$0xff] }
 0x23e   : > { %2050 = vmatpush.msrb.mxu3 %v1811_v12 }
 0x23f   : > { %v1456_v51 = vadd.f32 %v1455_v15, %v1433_v61  ;;  %2541 = vpow2.f32 %v1616_v39  ;;  %v1820_v61 = vld [vmem:[#allocation13 + $0x298] sm:$0xff] }
 0x240   : > { %2051 = vmatpush.msrb.mxu3 %v1810_v14 }
 0x241   : > { %v1479_v6 = vadd.f32 %v1478_v62, %v1456_v51 }
 0x242   : > { %2052 = vmatpush.msrb.mxu3 %v1809_v55  ;;  %v1818_v55 = vld [vmem:[#allocation13 + $0x288] sm:$0xff] }
 0x243   : > { %v1502_v23 = vadd.f32 %v1501_v21, %v1479_v6  ;;  %v1848_v21 = vld [vmem:[#allocation13 + $0x378] sm:$0xff] }
 0x244   : > { %2053 = vmatpush.msrb.mxu3 %v1808_v20 }
 0x245   : > { %v2542_v5 = vpop.eup %2541  ;;  %1969 = vmatmul.f32.vlgmr.msra.gmra.mxu3 %v3264_v47  ;;  %v1610_v25 = vmin.f32 %v1502_v23, 0.0  ;;  %vm1602_vm15 = vcmp.gt.f32.partialorder %v1502_v23, 0.0 }
 0x246   : > { %v2390_v27 = vadd.f32 -1.0, %v2542_v5  ;;  %2054 = vmatpush.msrb.mxu3 %v1807_v16  ;;  %v1846_v16 = vld [vmem:[#allocation13 + $0x368] sm:$0xff]  ;;  %v1845_v5 = vld [vmem:[#allocation13 + $0x360] sm:$0xff] }
 0x247   : > { %v1624_v32 = vmul.f32 1.442695, %v1610_v25  ;;  %v1567_v56 = vpop.f32.mrf.mxu0  ;;  %v1590_v59 = vpop.f32.mrf.mxu1  ;;  %v1844_v25 = vld [vmem:[#allocation13 + $0x358] sm:$0xff] }
 0x248   : > { %v3273_v33 = vsel %vm1598_vm14, %v1499_v3, %v2390_v27  ;;  %2055 = vmatpush.msrb.mxu3 %v1806_v24  ;;  %v1823_v3 = vld [vmem:[#allocation13 + $0x2b0] sm:$0xff] }
 0x249   : > { %1770 = vmatmul.f32.vlgmr.msra.gmra.mxu0 %v3273_v33  ;;  %2543 = vpow2.f32 %v1624_v32  ;;  %v1843_v27 = vld [vmem:[#allocation13 + $0x350] sm:$0xff] }
 0x24a   : > { %2068 = vmatpush.msra.mxu0 %v1832_v28  ;;  %2056 = vmatpush.msrb.mxu3 %v1805_v31  ;;  %v1842_v28 = vld [vmem:[#allocation13 + $0x348] sm:$0xff]  ;;  %v1840_v31 = vld [vmem:[#allocation13 + $0x338] sm:$0xff]  ;;  %v1839_v32 = vld [vmem:[#allocation13 + $0x330] sm:$0xff] }
 0x24c   : > { %2069 = vmatpush.msra.mxu0 %v1831_v35  ;;  %2057 = vmatpush.msrb.mxu3 %v1804_v29  ;;  %v1837_v35 = vld [vmem:[#allocation13 + $0x320] sm:$0xff]  ;;  %v1836_v29 = vld [vmem:[#allocation13 + $0x318] sm:$0xff] }
 0x24d   : > { %1972 = vmatmul.f32.gmra.mxu3 %v3269_v60 }
 0x24e   : > { %2070 = vmatpush.msra.mxu0 %v1830_v36  ;;  %2058 = vmatpush.msrb.mxu3 %v1803_v37  ;;  %v1833_v36 = vld [vmem:[#allocation13 + $0x300] sm:$0xff] }
 0x24f   : > { %v2544_v42 = vpop.eup %2543  ;;  %v1570_v39 = vpop.f32.mrf.mxu0 }
 0x250   : > { %2071 = vmatpush.msra.mxu0 %v1829_v40  ;;  %v2394_v45 = vadd.f32 -1.0, %v2544_v42  ;;  %2059 = vmatpush.msrb.mxu3 %v1802_v41  ;;  %v1593_v15 = vpop.f32.mrf.mxu1 }
 0x252   : > { %v3278_v49 = vsel %vm1602_vm15, %v1502_v23, %v2394_v45  ;;  %2072 = vmatpush.msra.mxu0 %v1828_v43  ;;  %2060 = vmatpush.msrb.mxu3 %v1801_v44  ;;  %v1847_v23 = vld [vmem:[#allocation13 + $0x370] sm:$0xff] }
 0x253   : > { %v1521_v50 = vpop.f32.mrf.mxu2  ;;  %1773 = vmatmul.f32.gmra.mxu0 %v3278_v49  ;;  %v1544_v54 = vpop.f32.mrf.mxu3 }
 0x254   : > { %v1522_v53 = vadd.f32 %v1521_v50, %v1223_v46  ;;  %2073 = vmatpush.msra.mxu0 %v1827_v48 }
 0x255   : > { %2061 = vmatmul.f32.vlgmr.msrb.gmra.mxu3 %v3253_v4 }
 0x256   : > { %v1545_v58 = vadd.f32 %v1544_v54, %v1522_v53  ;;  %2074 = vmatpush.msra.mxu0 %v1826_v52 }
 0x258   : > { %v1568_v2 = vadd.f32 %v1567_v56, %v1545_v58  ;;  %2075 = vmatpush.msra.mxu0 %v1825_v57 }
 0x25a   : > { %v1591_v7 = vadd.f32 %v1590_v59, %v1568_v2  ;;  %2076 = vmatpush.msra.mxu0 %v1824_v63  ;;  %v1863_v63 = vld [vmem:[#allocation13 + $0x3f0] sm:$0xff] }
 0x25b   : > { %v1524_v8 = vpop.f32.mrf.mxu2  ;;  %1992 = vmatmul.f32.vlgmr.msrb.gmra.mxu0 %v3273_v33  ;;  %v1547_v12 = vpop.f32.mrf.mxu3 }
 0x25c   : > { %v1607_v10 = vmin.f32 %v1591_v7, 0.0  ;;  %v1525_v11 = vadd.f32 %v1524_v8, %v1227_v0  ;;  %2077 = vmatpush.msra.mxu0 %v1823_v3  ;;  %vm1599_vm1 = vcmp.gt.f32.partialorder %v1591_v7, 0.0  ;;  %v1862_v0 = vld [vmem:[#allocation13 + $0x3e8] sm:$0xff] }
 0x25d   : > { %2064 = vmatmul.f32.gmra.mxu3 %v3259_v17 }
 0x25e   : > { %v1618_v4 = vmul.f32 1.442695, %v1607_v10  ;;  %v1548_v38 = vadd.f32 %v1547_v12, %v1525_v11  ;;  %2078 = vmatpush.msra.mxu0 %v1822_v9  ;;  %v1860_v10 = vld [vmem:[#allocation13 + $0x3d8] sm:$0xff]  ;;  %v2550_v12 = vld [vmem:[#allocation7 + $0x8] sm:$0xff] }
 0x260   : > { %v1571_v14 = vadd.f32 %v1570_v39, %v1548_v38  ;;  %2079 = vmatpush.msra.mxu0 %v1821_v13  ;;  %2545 = vpow2.f32 %v1618_v4  ;;  %v1859_v13 = vld [vmem:[#allocation13 + $0x3d0] sm:$0xff] }
 0x262   : > { %v1594_v51 = vadd.f32 %v1593_v15, %v1571_v14  ;;  %2080 = vmatpush.msra.mxu0 %v1820_v61  ;;  %v1858_v61 = vld [vmem:[#allocation13 + $0x3c8] sm:$0xff] }
 0x263   : > { %1995 = vmatmul.f32.gmra.mxu0 %v3278_v49 }
 0x264   : > { %2081 = vmatpush.msra.mxu0 %v1819_v19  ;;  %v1611_v62 = vmin.f32 %v1594_v51, 0.0  ;;  %vm1603_vm2 = vcmp.gt.f32.partialorder %v1594_v51, 0.0  ;;  %v1857_v19 = vld [vmem:[#allocation13 + $0x3c0] sm:$0xff] }
 0x266   : > { %v2546_v6 = vpop.eup %2545  ;;  %2082 = vmatpush.msra.mxu0 %v1818_v55  ;;  %v1626_v17 = vmul.f32 1.442695, %v1611_v62  ;;  %v1856_v55 = vld [vmem:[#allocation13 + $0x3b8] sm:$0xff]  ;;  %v1855_v62 = vld [vmem:[#allocation13 + $0x3b0] sm:$0xff] }
 0x267   : > { %v2391_v20 = vadd.f32 -1.0, %v2546_v6  ;;  %v1854_v6 = vld [vmem:[#allocation13 + $0x3a8] sm:$0xff] }
 0x268   : > { %2083 = vmatpush.msra.mxu0 %v1817_v1  ;;  %2547 = vpow2.f32 %v1626_v17  ;;  %v2551_v1 = vld [vmem:[#allocation8] sm:$0xff]  ;;  %v1853_v17 = vld [vmem:[#allocation13 + $0x3a0] sm:$0xff] }
 0x269   : > { %v3286_v22 = vsel %vm1599_vm1, %v1591_v7, %v2391_v20  ;;  %v1861_v7 = vld [vmem:[#allocation13 + $0x3e0] sm:$0xff]  ;;  %v1852_v20 = vld [vmem:[#allocation13 + $0x398] sm:$0xff] }
 0x26a   : > { %1793 = vmatmul.f32.vlgmr.msra.gmra.mxu1 %v3286_v22 }
 0x26b   : > { %2091 = vmatpush.msra.mxu1 %v1848_v21  ;;  %2084 = vmatmul.f32.vlgmr.msra.gmra.mxu0 %v3264_v47  ;;  %v1841_v47 = vld [vmem:[#allocation13 + $0x340] sm:$0xff]  ;;  %v1851_v21 = vld [vmem:[#allocation13 + $0x390] sm:$0xff] }
 0x26d   : > { %2092 = vmatpush.msra.mxu1 %v1847_v23  ;;  %v2552_v23 = vld [vmem:[#allocation8 + $0x8] sm:$0xff] }
 0x26e   : > { %v2548_v18 = vpop.eup %2547 }
 0x26f   : > { %2093 = vmatpush.msra.mxu1 %v1846_v16  ;;  %v2395_v24 = vadd.f32 -1.0, %v2548_v18  ;;  %v1850_v16 = vld [vmem:[#allocation13 + $0x388] sm:$0xff]  ;;  %v1849_v18 = vld [vmem:[#allocation13 + $0x380] sm:$0xff] }
 0x271   : > { %2094 = vmatpush.msra.mxu1 %v1845_v5  ;;  %v3290_v26 = vsel %vm1603_vm2, %v1594_v51, %v2395_v24 }
 0x272   : > { %1796 = vmatmul.f32.gmra.mxu1 %v3290_v26 }
 0x273   : > { %2095 = vmatpush.msra.mxu1 %v1844_v25  ;;  %2087 = vmatmul.f32.gmra.mxu0 %v3269_v60  ;;  %v1834_v60 = vld [vmem:[#allocation13 + $0x308] sm:$0xff] }
 0x275   : > { %2096 = vmatpush.msra.mxu1 %v1843_v27 }
 0x277   : > { %2097 = vmatpush.msra.mxu1 %v1842_v28 }
 0x279   : > { %2098 = vmatpush.msra.mxu1 %v1841_v47 }
 0x27a   : > { %2015 = vmatmul.f32.vlgmr.msrb.gmra.mxu1 %v3286_v22 }
 0x27b   : > { %2099 = vmatpush.msra.mxu1 %v1840_v31 }
 0x27d   : > { %2100 = vmatpush.msra.mxu1 %v1839_v32 }
 0x27f   : > { %2101 = vmatpush.msra.mxu1 %v1838_v34 }
 0x281   : > { %2102 = vmatpush.msra.mxu1 %v1837_v35 }
 0x282   : > { %2018 = vmatmul.f32.gmra.mxu1 %v3290_v26 }
 0x283   : > { %2103 = vmatpush.msra.mxu1 %v1836_v29 }
 0x285   : > { %2104 = vmatpush.msra.mxu1 %v1835_v30 }
 0x287   : > { %2105 = vmatpush.msra.mxu1 %v1834_v60 }
 0x289   : > { %2106 = vmatpush.msra.mxu1 %v1833_v36 }
 0x28a   : > { %2107 = vmatmul.f32.vlgmr.msra.gmra.mxu1 %v3273_v33  ;;  %v1864_v33 = vld [vmem:[#allocation13 + $0x3f8] sm:$0xff] }
 0x292   : > { %2110 = vmatmul.f32.gmra.mxu1 %v3278_v49  ;;  %v2549_v49 = vld [vmem:[#allocation7] sm:$0xff] }
 0x2a1   : > { %v1725_v40 = vpop.f32.mrf.mxu2 }
 0x2ac   : > { %v1728_v43 = vpop.f32.mrf.mxu2 }
 0x2b4   : > { %v1947_v57 = vpop.f32.mrf.mxu2 }
 0x2b6   : > { %v1748_v37 = vpop.f32.mrf.mxu3 }
 0x2b7   : > { %v1749_v48 = vadd.f32 %v1748_v37, %v1725_v40 }
 0x2bc   : > { %v1950_v8 = vpop.f32.mrf.mxu2 }
 0x2c0   : > { %v1751_v42 = vpop.f32.mrf.mxu3 }
 0x2c1   : > { %v1752_v46 = vadd.f32 %v1751_v42, %v1728_v43 }
 0x2c6   : > { %v1771_v41 = vpop.f32.mrf.mxu0 }
 0x2c7   : > { %v1772_v54 = vadd.f32 %v1771_v41, %v1749_v48 }
 0x2c8   : > { %v1970_v52 = vpop.f32.mrf.mxu3 }
 0x2c9   : > { %v1971_v4 = vadd.f32 %v1970_v52, %v1947_v57 }
 0x2d0   : > { %v1774_v44 = vpop.f32.mrf.mxu0  ;;  %v1973_v3 = vpop.f32.mrf.mxu3 }
 0x2d1   : > { %v1775_v50 = vadd.f32 %v1774_v44, %v1752_v46  ;;  %v1974_v11 = vadd.f32 %v1973_v3, %v1950_v8 }
 0x2d8   : > { %v1993_v58 = vpop.f32.mrf.mxu0  ;;  %v2062_v5 = vpop.f32.mrf.mxu3 }
 0x2d9   : > { %v1994_v14 = vadd.f32 %v1993_v58, %v1971_v4 }
 0x2e0   : > { %v1996_v9 = vpop.f32.mrf.mxu0  ;;  %v2065_v25 = vpop.f32.mrf.mxu3 }
 0x2e1   : > { %v1997_v38 = vadd.f32 %v1996_v9, %v1974_v11 }
 0x2e7   : > { %v1794_v45 = vpop.f32.mrf.mxu1 }
 0x2e8   : > { %v1795_v59 = vadd.f32 %v1794_v45, %v1772_v54  ;;  %v2085_v28 = vpop.f32.mrf.mxu0 }
 0x2ef   : > { %v1797_v53 = vpop.f32.mrf.mxu1 }
 0x2f0   : > { %v1798_v56 = vadd.f32 %v1797_v53, %v1775_v50 }
 0x2f2   : > { %2036 = vmatpush.msrb.mxu2 %v1798_v56 }
 0x2f4   : > { %2037 = vmatpush.msrb.mxu2 %v1795_v59 }
 0x2f5   : > { %2396 = vmatmul.msk.f32.vlgmr.msrb.gmra.mxu2 %vm456_vm0, %v2549_v49 }
 0x2f6   : > { %2114 = vmatpush.msra.mxu2 %v1864_v33 }
 0x2f7   : > { %v2016_v2 = vpop.f32.mrf.mxu1 }
 0x2f8   : > { %2115 = vmatpush.msra.mxu2 %v1863_v63  ;;  %v2017_v51 = vadd.f32 %v2016_v2, %v1994_v14 }
 0x2fa   : > { %2116 = vmatpush.msra.mxu2 %v1862_v0 }
 0x2fc   : > { %2117 = vmatpush.msra.mxu2 %v1861_v7 }
 0x2fd   : > { %2397 = vmatmul.msk.f32.gmra.mxu2 %vm456_vm0, %v2550_v12 }
 0x2fe   : > { %2118 = vmatpush.msra.mxu2 %v1860_v10 }
 0x2ff   : > { %v2019_v39 = vpop.f32.mrf.mxu1 }
 0x300   : > { %v2020_v15 = vadd.f32 %v2019_v39, %v1997_v38  ;;  %2119 = vmatpush.msra.mxu2 %v1859_v13 }
 0x302   : > { %2120 = vmatpush.msra.mxu2 %v1858_v61  ;;  %2151 = vmatpush.msra.mxu3 %v2020_v15 }
 0x304   : > { %2121 = vmatpush.msra.mxu2 %v1857_v19  ;;  %2152 = vmatpush.msra.mxu3 %v2017_v51 }
 0x305   : > { %2398 = vmatmul.msk.f32.vlgmr.msra.gmra.mxu3 %vm456_vm0, %v2551_v1 }
 0x306   : > { %2122 = vmatpush.msra.mxu2 %v1856_v55 }
 0x307   : > { %v2108_v32 = vpop.f32.mrf.mxu1 }
 0x308   : > { %2123 = vmatpush.msra.mxu2 %v1855_v62 }
 0x30a   : > { %2124 = vmatpush.msra.mxu2 %v1854_v6 }
 0x30c   : > { %2125 = vmatpush.msra.mxu2 %v1853_v17 }
 0x30d   : > { %2399 = vmatmul.msk.f32.gmra.mxu3 %vm456_vm0, %v2552_v23 }
 0x30e   : > { %2126 = vmatpush.msra.mxu2 %v1852_v20 }
 0x30f   : > { %v2111_v41 = vpop.f32.mrf.mxu1 }
 0x310   : > { %2127 = vmatpush.msra.mxu2 %v1851_v21 }
 0x312   : > { %2128 = vmatpush.msra.mxu2 %v1850_v16 }
 0x314   : > { %2129 = vmatpush.msra.mxu2 %v1849_v18 }
 0x315   : > { %2130 = vmatmul.f32.vlgmr.msra.gmra.mxu2 %v3286_v22  ;;  %v2516_v22 = vld [vmem:[%s3349_s7] ss:$0 sm:$0xff] }
 0x31d   : > { %2133 = vmatmul.f32.gmra.mxu2 %v3290_v26  ;;  %v2088_v26 = vpop.f32.mrf.mxu0 }
 0x378   : > { %v2039_v24 = vpop.f32.mrf.mxu2 }
 0x379   : > { %v2063_v27 = vadd.f32 %v2062_v5, %v2039_v24 }
 0x37b   : > { %v2086_v31 = vadd.f32 %v2085_v28, %v2063_v27 }
 0x37d   : > { %v2109_v29 = vadd.f32 %v2108_v32, %v2086_v31 }
 0x380   : > { %v2042_v47 = vpop.f32.mrf.mxu2 }
 0x381   : > { %v2066_v35 = vadd.f32 %v2065_v25, %v2042_v47 }
 0x383   : > { %v2089_v36 = vadd.f32 %v2088_v26, %v2066_v35 }
 0x385   : > { %v2112_v42 = vadd.f32 %v2111_v41, %v2089_v36 }
 0x388   : > { %v2154_v34 = vpop.f32.mrf.mxu3 }
 0x390   : > { %v2157_v44 = vpop.f32.mrf.mxu3 }
 0x398   : > { %v2131_v30 = vpop.f32.mrf.mxu2 }
 0x399   : > { %v2132_v60 = vadd.f32 %v2131_v30, %v2109_v29 }
 0x39b   : > { %v2160_v37 = vadd.f32 %v2154_v34, %v2132_v60 }
 0x39d   : > { %v2166_v40 = vadd.f32 %v2516_v22, %v2160_v37 }
 0x39f   : > { %2168 = vst [vmem:[%s449_s23] sm:$0xff] %v2166_v40 }
 0x3a0   : > { %v2134_v43 = vpop.f32.mrf.mxu2 }
 0x3a1   : > { %v2135_v45 = vadd.f32 %v2134_v43, %v2112_v42 }
 0x3a3   : > { %v2161_v46 = vadd.f32 %v2157_v44, %v2135_v45 }
 0x3a5   : > { %v2167_v48 = vadd.f32 %v2516_v22, %v2161_v46 }
 0x3a7   : > { %2169 = vst [vmem:[%s449_s23 + $0x8] sm:$0xff] %v2167_v48 }
 0x3a8   : > { %2790 = shalt.err (!%p2787_p8)
}
 0x3a9   : > { %s2856_s24 = smov 128   ;;  %s2857_s10 = smov 8  }
 0x3aa   : > { %2432 = dma.vmem_to_hbm [thread:$0]  (%p3008_p0), %s2184_s3, 256, %s2186_s17, %s2171_s12, %s2856_s24, %s2856_s24, %s2857_s10  }
 0x3ab PF: > { %s2200_s22 = sand.u32 1, %s2833_s27   ;;  %p3379_p10 = scmp.ge.s32.totalorder %s2845_s30, 2 }
 0x3ac   : > { %s2201_s26 = scalar_lea.sflag [#allocation4], %s2200_s22 }
 0x3ad   : > { %p2458_p11 = pnand %p3379_p10, %p3016_p6 }
 0x3af   : > { %p2459_p12 = pneg %p2458_p11 }
 0x3b1   : > { %2828 = dma.done.wait (%p2459_p12), %s2201_s26, 256  }
 0x3b2   : > { %2830 = vsyncadd (%p2459_p12), %s2201_s26, 4294967040  ;;  %s3380_s20 = sld [smem:[#allocation21_spill]]  ;;  %p26_p2 = scmp.ge.s32.totalorder %s2984_s14, 4  }
 0x3b3   : > { %s3381_s29 = sld [smem:[#allocation22_spill]]  ;;  %s3382_s27 = smov %s2837_s28 }
 0x3b4   : > { %s3384_s30 = smov %s2984_s14  ;;  %28 = sbr.rel (!%p26_p2) target bundleno = 15 (0xf), region = 134 }
 0x3b8   : > { %s3383_s28 = smov %s3380_s20 }
 0x3b9   :  { %2207 = vsyncpa [#allocation3], 1 }
 0x3ba   :  { %2209 = vsyncpa [#allocation3 + $0x1], 1 }
 0x3bb   :  { %2210 = vsyncpa [#allocation6], 1 }
 0x3bc   :  { %2212 = vsyncpa [#allocation6 + $0x1], 1 }
 0x3bd   :  { %2213 = vsyncpa [#allocation9], 1 }
 0x3be   :  { %2214 = vsyncpa [#allocation12], 1 }
 0x3bf   :  { %2215 = vsyncpa [#allocation4], 1 }
 0x3c0   :  { %2217 = vsyncpa [#allocation4 + $0x1], 1 }

</bundles_post_ra>
